<compile_context>
chip_gen: v5e
topology: v5e:2x2
jax: 0.10.0
libtpu: 0.0.40
codegen_flags: <defaults>
</compile_context>

<pallas_src>
import math

import jax
import jax.numpy as jnp
from jax.experimental import pallas as pl

# ---- small synthetic XLNet hyper-parameters -------------------------------
VOCAB = 64
D_MODEL = 32
N_HEAD = 4
D_HEAD = D_MODEL // N_HEAD
D_INNER = 64
N_LAYER = 2
SEQ = 8
BATCH = 2
PAD = 0
LN_EPS = 1e-12
NEG_INF = 1e30


# ---------------------------------------------------------------------------
# Fused whole-model kernel: embedding in, all layers, stacked hidden states out
# ---------------------------------------------------------------------------
def xlnet_kernel(x_ref, bias_ref, posg_ref, gsum_ref, hmask_ref,
                 qkv_w_ref, rwb_ref, rrb_ref, rw_ref, o_w_ref,
                 ln1g_ref, ln1b_ref, ff1w_ref, ff1b_ref,
                 ff2w_ref, ff2b_ref, ln2g_ref, ln2b_ref,
                 out_ref):
    """XLNet forward, all layers / heads / batch in one launch.

    x_ref    : (BS, D)        token embeddings, batch folded into rows
    bias_ref : (H*BS, BS)     additive attention bias (0 valid / -1e30 masked),
                              tiled over heads along sublanes
    posg_ref : (H*BS, S*D)    pre-gathered relative position encodings
                              (rel_shift folded in), tiled over heads
    gsum_ref : (S*D, BS) bf16 0/1 selector summing each D-wide lane group onto
                              key column b*S + j (batch-widened)
    hmask_ref: (H*BS, D)      head block mask: row block h keeps lanes of head h
    weights  : stacked with a leading layer axis L = N_LAYER; matmul weights
               are bf16, q-projection + rwb/rrb pre-scaled by 1/sqrt(d_head)
    out_ref  : (L+1, BS, D)   hidden states (embedding output + each layer)
    """
    BS = BATCH * SEQ
    x = x_ref[...]            # (BS, D)      f32
    bias = bias_ref[...]      # (H*BS, BS)   f32
    posg = posg_ref[...]      # (H*BS, S*D)  f32
    gsum = gsum_ref[...]      # (S*D, BS)    bf16 (0/1, exact)
    hmask = hmask_ref[...]    # (H*BS, D)    f32 (0/1)

    def bf(t):                # cast only at dot boundaries
        return t.astype(jnp.bfloat16)

    def layer_norm(y, g, b):
        mu = jnp.mean(y, axis=-1, keepdims=True)
        var = jnp.mean((y - mu) ** 2, axis=-1, keepdims=True)
        return (y - mu) * jax.lax.rsqrt(var + LN_EPS) * g + b

    def dot_t(a, b):          # a @ b.T, bf16 operands, f32 accumulate
        return jax.lax.dot_general(a, b, (((1,), (1,)), ((), ())),
                                   preferred_element_type=jnp.float32)

    def gelu_erf(t):
        # HF XLNet uses exact erf-GELU.  Polynomial erf (A&S 7.1.26,
        # |err| < 1.5e-7) keeps the lowering to basic VPU/EUP ops.
        z = jnp.abs(t) * (1.0 / math.sqrt(2.0))
        sgn = jnp.where(t >= 0.0, 1.0, -1.0)
        u = 1.0 / (1.0 + 0.3275911 * z)
        poly = u * (0.254829592 + u * (-0.284496736 + u * (1.421413741
                    + u * (-1.453152027 + u * 1.061405429))))
        erf = sgn * (1.0 - poly * jnp.exp(-z * z))
        return 0.5 * t * (1.0 + erf)

    out_ref[0] = x

    for l in range(N_LAYER):               # static unroll: static weight indexing
        # fused full-width q|k|v projection: one MXU pass for all heads
        qkv = jnp.dot(bf(x), qkv_w_ref[l], preferred_element_type=jnp.float32)
        q = qkv[:, :D_MODEL]                               # (BS, D)
        k = qkv[:, D_MODEL:2 * D_MODEL]                    # (BS, D)
        v = qkv[:, 2 * D_MODEL:]                           # (BS, D)

        # bias adds hoisted out of the (removed) head loop; scale is folded in
        q_w = q + rwb_ref[l]                               # (BS, D)
        q_r = q + rrb_ref[l]                               # (BS, D)

        # batch heads on the sublane axis with a block mask -> block-diagonal
        # queries; all per-head matmuls collapse into one matmul each
        qw_bd = jnp.concatenate([q_w] * N_HEAD, axis=0) * hmask   # (H*BS, D)
        qr_bd = jnp.concatenate([q_r] * N_HEAD, axis=0) * hmask   # (H*BS, D)

        # content-content term, all heads at once
        ac = dot_t(bf(qw_bd), bf(k))                       # (H*BS, BS)

        # content-position term with rel_shift folded into posg:
        #   bd[h*BS+r, b*S+j] = sum_d (qr_bd @ rw^T)[h*BS+r, d] * pos[S - r%S + j, d]
        qr_p = dot_t(bf(qr_bd), rw_ref[l])                 # (H*BS, D)
        prod = jnp.concatenate([qr_p] * SEQ, axis=1) * posg            # (H*BS, S*D)
        bd = jnp.dot(bf(prod), gsum, preferred_element_type=jnp.float32)  # (H*BS, BS)

        # per-head softmax == per-row softmax in this layout
        score = ac + bd + bias
        score = score - jnp.max(score, axis=-1, keepdims=True)
        p = jnp.exp(score)
        p = p * pl.reciprocal(jnp.sum(p, axis=-1, keepdims=True), approx=True)

        # attention output for all heads in one matmul; keep each head block's
        # own lanes and collapse the head (sublane) blocks with 3 adds
        t = jnp.dot(bf(p), bf(v), preferred_element_type=jnp.float32) * hmask
        av = t[0:BS]
        for h in range(1, N_HEAD):
            av = av + t[h * BS:(h + 1) * BS]               # (BS, D)

        attn = jnp.dot(bf(av), o_w_ref[l], preferred_element_type=jnp.float32)
        h1 = layer_norm(x + attn, ln1g_ref[l], ln1b_ref[l])

        # position-wise feed-forward (erf GELU, as in HF XLNet)
        z = jnp.dot(bf(h1), ff1w_ref[l],
                    preferred_element_type=jnp.float32) + ff1b_ref[l]
        z = gelu_erf(z)
        z = jnp.dot(bf(z), ff2w_ref[l],
                    preferred_element_type=jnp.float32) + ff2b_ref[l]
        x = layer_norm(h1 + z, ln2g_ref[l], ln2b_ref[l])

        out_ref[l + 1] = x


# ---------------------------------------------------------------------------
# Glue: parameters, sinusoidal relative positions, embedding, forward
# ---------------------------------------------------------------------------
def relative_positional_encoding(seq_len, d_model):
    pos_seq = jnp.arange(seq_len, -seq_len, -1.0, dtype=jnp.float32)          # (2S,)
    inv_freq = 1.0 / (10000.0 ** (jnp.arange(0, d_model, 2, dtype=jnp.float32)
                                  / d_model))
    sinusoid = pos_seq[:, None] * inv_freq[None, :]                           # (2S, D/2)
    return jnp.concatenate([jnp.sin(sinusoid), jnp.cos(sinusoid)], axis=-1)   # (2S, D)


def init_params(key):
    # TODO(synk): synthetic deterministic weights stand in for the
    # xlnet-large-cased checkpoint (no file / network access allowed).
    def nrm(k, shape, scale=0.02):
        return (scale * jax.random.normal(k, shape)).astype(jnp.float32)

    L, D, H, dh, DI = N_LAYER, D_MODEL, N_HEAD, D_HEAD, D_INNER
    ks = jax.random.split(key, 8)
    return {
        "word_emb": nrm(ks[0], (VOCAB, D)),
        "qkv_w":    nrm(ks[1], (L, D, 3 * D)),     # fused q|k|v projection
        "r_w":      nrm(ks[2], (L, D, D)),         # relative-position projection
        "o_w":      nrm(ks[3], (L, D, D)),         # output projection (pre-transposed)
        "r_w_bias": nrm(ks[4], (L, H, dh)),
        "r_r_bias": nrm(ks[5], (L, H, dh)),
        "ln1_g":    jnp.ones((L, 1, D), jnp.float32),
        "ln1_b":    jnp.zeros((L, 1, D), jnp.float32),
        "ff1_w":    nrm(ks[6], (L, D, DI)),
        "ff1_b":    jnp.zeros((L, 1, DI), jnp.float32),
        "ff2_w":    nrm(ks[7], (L, DI, D)),
        "ff2_b":    jnp.zeros((L, 1, D), jnp.float32),
        "ln2_g":    jnp.ones((L, 1, D), jnp.float32),
        "ln2_b":    jnp.zeros((L, 1, D), jnp.float32),
    }


def xlnet_forward(ids, params):
    B, S = ids.shape
    D, H, dh, L = D_MODEL, N_HEAD, D_HEAD, N_LAYER
    bs = B * S
    scale = 1.0 / math.sqrt(dh)

    # the module overrides the passed mask: mask = ids.ne(pad).float()
    mask = (ids != PAD).astype(jnp.float32)                       # (B, S)
    x0 = params["word_emb"][ids].reshape(bs, D)                   # embedding lookup

    # additive attention bias: 0 for valid same-batch keys, -1e30 otherwise
    # (pad-key masking + batch fold in one add), tiled over heads on sublanes
    batch_of_row = jnp.repeat(jnp.arange(B), S)                   # (bs,)
    same_batch = (batch_of_row[:, None] ==
                  batch_of_row[None, :]).astype(jnp.float32)      # (bs, bs)
    bias = (same_batch * mask.reshape(1, bs) - 1.0) * NEG_INF     # (bs, bs)
    bias_bd = jnp.tile(bias, (H, 1))                              # (H*bs, bs)

    # pre-gathered relative positional encodings implementing rel_shift:
    # posg[r, j*D:(j+1)*D] = pos_emb[S - (r % S) + j]; tiled over heads
    pos = relative_positional_encoding(S, D)                      # (2S, D)
    qi = jnp.arange(bs) % S
    m_idx = S - qi[:, None] + jnp.arange(S)[None, :]              # (bs, S) in [1, 2S-1]
    posg = pos[m_idx].reshape(bs, S * D)                          # (bs, S*D)
    posg_bd = jnp.tile(posg, (H, 1))                              # (H*bs, S*D)

    # widened 0/1 group-sum selector: column b*S + j sums lane group j
    # (produces (H*bs, bs) directly -> no in-kernel batch concat)
    grp = jnp.arange(S * D)[:, None] // D                         # (S*D, 1)
    key_off = (jnp.arange(bs) % S)[None, :]                       # (1, bs)
    gsum = (grp == key_off).astype(jnp.bfloat16)                  # (S*D, bs)

    # head block mask: sublane block h keeps only lanes of head h
    head_of_row = jnp.repeat(jnp.arange(H), bs)                   # (H*bs,)
    head_of_lane = jnp.arange(D) // dh                            # (D,)
    hmask = (head_of_row[:, None] ==
             head_of_lane[None, :]).astype(jnp.float32)           # (H*bs, D)

    # init-time weight transforms:
    #  * fold 1/sqrt(d_head) into the q projection and the r_w/r_r biases
    #  * flatten per-head biases to (L, 1, D) so the adds hoist out of heads
    #  * cast every matmul weight to bf16 (f32 MXU accumulation in-kernel)
    qkv_w = params["qkv_w"].at[:, :, :D].multiply(scale).astype(jnp.bfloat16)
    rwb = (params["r_w_bias"] * scale).reshape(L, 1, D)
    rrb = (params["r_r_bias"] * scale).reshape(L, 1, D)
    rw = params["r_w"].astype(jnp.bfloat16)
    o_w = params["o_w"].astype(jnp.bfloat16)
    ff1w = params["ff1_w"].astype(jnp.bfloat16)
    ff2w = params["ff2_w"].astype(jnp.bfloat16)

    out = pl.pallas_call(
        xlnet_kernel,
        out_shape=jax.ShapeDtypeStruct((L + 1, bs, D), jnp.float32),
    )(x0, bias_bd, posg_bd, gsum, hmask,
      qkv_w, rwb, rrb, rw, o_w,
      params["ln1_g"], params["ln1_b"], ff1w, params["ff1_b"],
      ff2w, params["ff2_b"], params["ln2_g"], params["ln2_b"])

    # out[1] of XLNetModel(..., output_hidden_states=True) with mem_len=None:
    # the tuple of hidden states (embedding output + every layer output).
    return out.reshape(L + 1, B, S, D)


if __name__ == "__main__":
    key = jax.random.PRNGKey(0)
    k_params, k_ids = jax.random.split(key)
    params = init_params(k_params)

    ids = jax.random.randint(k_ids, (BATCH, SEQ), 1, VOCAB, dtype=jnp.int32)
    ids = ids.at[0, -2:].set(PAD)   # include some padding tokens

    out = jax.jit(lambda i: xlnet_forward(i, params))(ids)
    jax.block_until_ready(out)
    assert out.shape == (N_LAYER + 1, BATCH, SEQ, D_MODEL)
    assert bool(jnp.all(jnp.isfinite(out)))
    print("KERNEL_OK")
</pallas_src>

<mosaic_0001>
module attributes {stable_mosaic.version = 11 : i64} {
  func.func @xlnet_kernel(%arg0: memref<16x32xf32, #tpu.memory_space<vmem>>, %arg1: memref<64x16xf32, #tpu.memory_space<vmem>>, %arg2: memref<64x256xf32, #tpu.memory_space<vmem>>, %arg3: memref<256x16xbf16, #tpu.memory_space<vmem>>, %arg4: memref<64x32xf32, #tpu.memory_space<vmem>>, %arg5: memref<2x32x96xbf16, #tpu.memory_space<vmem>>, %arg6: memref<2x1x32xf32, #tpu.memory_space<vmem>>, %arg7: memref<2x1x32xf32, #tpu.memory_space<vmem>>, %arg8: memref<2x32x32xbf16, #tpu.memory_space<vmem>>, %arg9: memref<2x32x32xbf16, #tpu.memory_space<vmem>>, %arg10: memref<2x1x32xf32, #tpu.memory_space<vmem>>, %arg11: memref<2x1x32xf32, #tpu.memory_space<vmem>>, %arg12: memref<2x32x64xbf16, #tpu.memory_space<vmem>>, %arg13: memref<2x1x64xf32, #tpu.memory_space<vmem>>, %arg14: memref<2x64x32xbf16, #tpu.memory_space<vmem>>, %arg15: memref<2x1x32xf32, #tpu.memory_space<vmem>>, %arg16: memref<2x1x32xf32, #tpu.memory_space<vmem>>, %arg17: memref<2x1x32xf32, #tpu.memory_space<vmem>>, %arg18: memref<3x16x32xf32, #tpu.memory_space<vmem>>) attributes {dimension_semantics = [], scalar_prefetch = 0 : i64, scratch_operands = 0 : i64, tpu.core_type = #tpu.core_type<tc>} {
    %c0 = arith.constant 0 : index
    %c0_0 = arith.constant 0 : index
    %0 = vector.load %arg0[%c0, %c0_0] : memref<16x32xf32, #tpu.memory_space<vmem>>, vector<16x32xf32>
    %c0_1 = arith.constant 0 : index
    %c0_2 = arith.constant 0 : index
    %1 = vector.load %arg1[%c0_1, %c0_2] : memref<64x16xf32, #tpu.memory_space<vmem>>, vector<64x16xf32>
    %c0_3 = arith.constant 0 : index
    %c0_4 = arith.constant 0 : index
    %2 = vector.load %arg2[%c0_3, %c0_4] : memref<64x256xf32, #tpu.memory_space<vmem>>, vector<64x256xf32>
    %c0_5 = arith.constant 0 : index
    %c0_6 = arith.constant 0 : index
    %3 = vector.load %arg3[%c0_5, %c0_6] : memref<256x16xbf16, #tpu.memory_space<vmem>>, vector<256x16xbf16>
    %c0_7 = arith.constant 0 : index
    %c0_8 = arith.constant 0 : index
    %4 = vector.load %arg4[%c0_7, %c0_8] : memref<64x32xf32, #tpu.memory_space<vmem>>, vector<64x32xf32>
    %c0_9 = arith.constant 0 : index
    %c0_10 = arith.constant 0 : index
    %c0_11 = arith.constant 0 : index
    %5 = vector.load %arg18[%c0_9, %c0_10, %c0_11] : memref<3x16x32xf32, #tpu.memory_space<vmem>>, vector<1x16x32xf32>
    %6 = vector.shape_cast %5 : vector<1x16x32xf32> to vector<16x32xf32>
    %7 = vector.shape_cast %0 : vector<16x32xf32> to vector<1x16x32xf32>
    tpu.vector_store %arg18[%c0_9, %c0_10, %c0_11], %7 {strides = array<i32>} : memref<3x16x32xf32, #tpu.memory_space<vmem>>, vector<1x16x32xf32>,
    %8 = arith.truncf %0 : vector<16x32xf32> to vector<16x32xbf16>
    %c0_12 = arith.constant 0 : index
    %c0_13 = arith.constant 0 : index
    %c0_14 = arith.constant 0 : index
    %9 = vector.load %arg5[%c0_12, %c0_13, %c0_14] : memref<2x32x96xbf16, #tpu.memory_space<vmem>>, vector<1x32x96xbf16>
    %10 = vector.shape_cast %9 : vector<1x32x96xbf16> to vector<32x96xbf16>
    %cst = arith.constant dense<0.000000e+00> : vector<16x96xf32>
    %11 = tpu.matmul %8, %10, %cst {dimension_numbers = #tpu.dot_dimension_numbers<[1], [0], [0], [1], [0, 0, 1, 1], [], []>} : vector<16x32xbf16>, vector<32x96xbf16>, vector<16x96xf32> -> vector<16x96xf32>
    %12 = vector.extract_strided_slice %11 {offsets = [0, 0], sizes = [16, 32], strides = [1, 1]} : vector<16x96xf32> to vector<16x32xf32>
    %13 = vector.extract_strided_slice %11 {offsets = [0, 32], sizes = [16, 32], strides = [1, 1]} : vector<16x96xf32> to vector<16x32xf32>
    %14 = vector.extract_strided_slice %11 {offsets = [0, 64], sizes = [16, 32], strides = [1, 1]} : vector<16x96xf32> to vector<16x32xf32>
    %c0_15 = arith.constant 0 : index
    %c0_16 = arith.constant 0 : index
    %c0_17 = arith.constant 0 : index
    %15 = vector.load %arg6[%c0_15, %c0_16, %c0_17] : memref<2x1x32xf32, #tpu.memory_space<vmem>>, vector<1x1x32xf32>
    %16 = vector.shape_cast %15 : vector<1x1x32xf32> to vector<1x32xf32>
    %17 = vector.broadcast %16 : vector<1x32xf32> to vector<16x32xf32>
    %18 = arith.addf %12, %17 : vector<16x32xf32>
    %c0_18 = arith.constant 0 : index
    %c0_19 = arith.constant 0 : index
    %c0_20 = arith.constant 0 : index
    %19 = vector.load %arg7[%c0_18, %c0_19, %c0_20] : memref<2x1x32xf32, #tpu.memory_space<vmem>>, vector<1x1x32xf32>
    %20 = vector.shape_cast %19 : vector<1x1x32xf32> to vector<1x32xf32>
    %21 = vector.broadcast %20 : vector<1x32xf32> to vector<16x32xf32>
    %22 = arith.addf %12, %21 : vector<16x32xf32>
    %23 = tpu.concatenate %18, %18, %18, %18 in 0 : vector<16x32xf32>, vector<16x32xf32>, vector<16x32xf32>, vector<16x32xf32> -> vector<64x32xf32>
    %24 = arith.mulf %23, %4 : vector<64x32xf32>
    %25 = tpu.concatenate %22, %22, %22, %22 in 0 : vector<16x32xf32>, vector<16x32xf32>, vector<16x32xf32>, vector<16x32xf32> -> vector<64x32xf32>
    %26 = arith.mulf %25, %4 : vector<64x32xf32>
    %27 = arith.truncf %24 : vector<64x32xf32> to vector<64x32xbf16>
    %28 = arith.truncf %13 : vector<16x32xf32> to vector<16x32xbf16>
    %cst_21 = arith.constant dense<0.000000e+00> : vector<64x16xf32>
    %29 = tpu.matmul %27, %28, %cst_21 {dimension_numbers = #tpu.dot_dimension_numbers<[1], [1], [0], [0], [0, 0, 1, 0], [], []>} : vector<64x32xbf16>, vector<16x32xbf16>, vector<64x16xf32> -> vector<64x16xf32>
    %30 = arith.truncf %26 : vector<64x32xf32> to vector<64x32xbf16>
    %c0_22 = arith.constant 0 : index
    %c0_23 = arith.constant 0 : index
    %c0_24 = arith.constant 0 : index
    %31 = vector.load %arg8[%c0_22, %c0_23, %c0_24] : memref<2x32x32xbf16, #tpu.memory_space<vmem>>, vector<1x32x32xbf16>
    %32 = vector.shape_cast %31 : vector<1x32x32xbf16> to vector<32x32xbf16>
    %cst_25 = arith.constant dense<0.000000e+00> : vector<64x32xf32>
    %33 = tpu.matmul %30, %32, %cst_25 {dimension_numbers = #tpu.dot_dimension_numbers<[1], [1], [0], [0], [0, 0, 1, 0], [], []>} : vector<64x32xbf16>, vector<32x32xbf16>, vector<64x32xf32> -> vector<64x32xf32>
    %34 = tpu.concatenate %33, %33, %33, %33, %33, %33, %33, %33 in 1 : vector<64x32xf32>, vector<64x32xf32>, vector<64x32xf32>, vector<64x32xf32>, vector<64x32xf32>, vector<64x32xf32>, vector<64x32xf32>, vector<64x32xf32> -> vector<64x256xf32>
    %35 = arith.mulf %34, %2 : vector<64x256xf32>
    %36 = arith.truncf %35 : vector<64x256xf32> to vector<64x256xbf16>
    %cst_26 = arith.constant dense<0.000000e+00> : vector<64x16xf32>
    %37 = tpu.matmul %36, %3, %cst_26 {dimension_numbers = #tpu.dot_dimension_numbers<[1], [0], [0], [1], [0, 0, 1, 1], [], []>} : vector<64x256xbf16>, vector<256x16xbf16>, vector<64x16xf32> -> vector<64x16xf32>
    %38 = arith.addf %29, %37 : vector<64x16xf32>
    %39 = arith.addf %38, %1 : vector<64x16xf32>
    %cst_27 = arith.constant dense<0xFF800000> : vector<64xf32>
    %40 = vector.multi_reduction <maximumf>, %39, %cst_27 [1] : vector<64x16xf32> to vector<64xf32>
    %41 = vector.shape_cast %40 : vector<64xf32> to vector<64x1xf32>
    %42 = vector.broadcast %41 : vector<64x1xf32> to vector<64x16xf32>
    %43 = arith.subf %39, %42 : vector<64x16xf32>
    %44 = math.exp %43 : vector<64x16xf32>
    %cst_28 = arith.constant dense<0.000000e+00> : vector<64xf32>
    %45 = vector.multi_reduction <add>, %44, %cst_28 [1] : vector<64x16xf32> to vector<64xf32>
    %46 = vector.shape_cast %45 : vector<64xf32> to vector<64x1xf32>
    %47 = tpu.reciprocal %46 {approx = true} : vector<64x1xf32> -> vector<64x1xf32>
    %48 = vector.broadcast %47 : vector<64x1xf32> to vector<64x16xf32>
    %49 = arith.mulf %44, %48 : vector<64x16xf32>
    %50 = arith.truncf %49 : vector<64x16xf32> to vector<64x16xbf16>
    %51 = arith.truncf %14 : vector<16x32xf32> to vector<16x32xbf16>
    %cst_29 = arith.constant dense<0.000000e+00> : vector<64x32xf32>
    %52 = tpu.matmul %50, %51, %cst_29 {dimension_numbers = #tpu.dot_dimension_numbers<[1], [0], [0], [1], [0, 0, 1, 1], [], []>} : vector<64x16xbf16>, vector<16x32xbf16>, vector<64x32xf32> -> vector<64x32xf32>
    %53 = arith.mulf %52, %4 : vector<64x32xf32>
    %54 = vector.extract_strided_slice %53 {offsets = [0, 0], sizes = [16, 32], strides = [1, 1]} : vector<64x32xf32> to vector<16x32xf32>
    %55 = vector.extract_strided_slice %53 {offsets = [16, 0], sizes = [16, 32], strides = [1, 1]} : vector<64x32xf32> to vector<16x32xf32>
    %56 = arith.addf %54, %55 : vector<16x32xf32>
    %57 = vector.extract_strided_slice %53 {offsets = [32, 0], sizes = [16, 32], strides = [1, 1]} : vector<64x32xf32> to vector<16x32xf32>
    %58 = arith.addf %56, %57 : vector<16x32xf32>
    %59 = vector.extract_strided_slice %53 {offsets = [48, 0], sizes = [16, 32], strides = [1, 1]} : vector<64x32xf32> to vector<16x32xf32>
    %60 = arith.addf %58, %59 : vector<16x32xf32>
    %61 = arith.truncf %60 : vector<16x32xf32> to vector<16x32xbf16>
    %c0_30 = arith.constant 0 : index
    %c0_31 = arith.constant 0 : index
    %c0_32 = arith.constant 0 : index
    %62 = vector.load %arg9[%c0_30, %c0_31, %c0_32] : memref<2x32x32xbf16, #tpu.memory_space<vmem>>, vector<1x32x32xbf16>
    %63 = vector.shape_cast %62 : vector<1x32x32xbf16> to vector<32x32xbf16>
    %cst_33 = arith.constant dense<0.000000e+00> : vector<16x32xf32>
    %64 = tpu.matmul %61, %63, %cst_33 {dimension_numbers = #tpu.dot_dimension_numbers<[1], [0], [0], [1], [0, 0, 1, 1], [], []>} : vector<16x32xbf16>, vector<32x32xbf16>, vector<16x32xf32> -> vector<16x32xf32>
    %65 = arith.addf %0, %64 : vector<16x32xf32>
    %c0_34 = arith.constant 0 : index
    %c0_35 = arith.constant 0 : index
    %c0_36 = arith.constant 0 : index
    %66 = vector.load %arg10[%c0_34, %c0_35, %c0_36] : memref<2x1x32xf32, #tpu.memory_space<vmem>>, vector<1x1x32xf32>
    %67 = vector.shape_cast %66 : vector<1x1x32xf32> to vector<1x32xf32>
    %c0_37 = arith.constant 0 : index
    %c0_38 = arith.constant 0 : index
    %c0_39 = arith.constant 0 : index
    %68 = vector.load %arg11[%c0_37, %c0_38, %c0_39] : memref<2x1x32xf32, #tpu.memory_space<vmem>>, vector<1x1x32xf32>
    %69 = vector.shape_cast %68 : vector<1x1x32xf32> to vector<1x32xf32>
    %cst_40 = arith.constant dense<0.000000e+00> : vector<16xf32>
    %70 = vector.multi_reduction <add>, %65, %cst_40 [1] : vector<16x32xf32> to vector<16xf32>
    %71 = vector.shape_cast %70 : vector<16xf32> to vector<16x1xf32>
    %cst_41 = arith.constant 3.200000e+01 : f32
    %72 = vector.broadcast %cst_41 : f32 to vector<16x1xf32>
    %73 = arith.divf %71, %72 : vector<16x1xf32>
    %74 = vector.broadcast %73 : vector<16x1xf32> to vector<16x32xf32>
    %75 = arith.subf %65, %74 : vector<16x32xf32>
    %76 = arith.mulf %75, %75 : vector<16x32xf32>
    %cst_42 = arith.constant dense<0.000000e+00> : vector<16xf32>
    %77 = vector.multi_reduction <add>, %76, %cst_42 [1] : vector<16x32xf32> to vector<16xf32>
    %78 = vector.shape_cast %77 : vector<16xf32> to vector<16x1xf32>
    %cst_43 = arith.constant 3.200000e+01 : f32
    %79 = vector.broadcast %cst_43 : f32 to vector<16x1xf32>
    %80 = arith.divf %78, %79 : vector<16x1xf32>
    %81 = vector.broadcast %73 : vector<16x1xf32> to vector<16x32xf32>
    %82 = arith.subf %65, %81 : vector<16x32xf32>
    %cst_44 = arith.constant 9.99999996E-13 : f32
    %83 = vector.broadcast %cst_44 : f32 to vector<16x1xf32>
    %84 = arith.addf %80, %83 : vector<16x1xf32>
    %85 = math.rsqrt %84 : vector<16x1xf32>
    %86 = vector.broadcast %85 : vector<16x1xf32> to vector<16x32xf32>
    %87 = arith.mulf %82, %86 : vector<16x32xf32>
    %88 = vector.broadcast %67 : vector<1x32xf32> to vector<16x32xf32>
    %89 = arith.mulf %87, %88 : vector<16x32xf32>
    %90 = vector.broadcast %69 : vector<1x32xf32> to vector<16x32xf32>
    %91 = arith.addf %89, %90 : vector<16x32xf32>
    %92 = arith.truncf %91 : vector<16x32xf32> to vector<16x32xbf16>
    %c0_45 = arith.constant 0 : index
    %c0_46 = arith.constant 0 : index
    %c0_47 = arith.constant 0 : index
    %93 = vector.load %arg12[%c0_45, %c0_46, %c0_47] : memref<2x32x64xbf16, #tpu.memory_space<vmem>>, vector<1x32x64xbf16>
    %94 = vector.shape_cast %93 : vector<1x32x64xbf16> to vector<32x64xbf16>
    %cst_48 = arith.constant dense<0.000000e+00> : vector<16x64xf32>
    %95 = tpu.matmul %92, %94, %cst_48 {dimension_numbers = #tpu.dot_dimension_numbers<[1], [0], [0], [1], [0, 0, 1, 1], [], []>} : vector<16x32xbf16>, vector<32x64xbf16>, vector<16x64xf32> -> vector<16x64xf32>
    %c0_49 = arith.constant 0 : index
    %c0_50 = arith.constant 0 : index
    %c0_51 = arith.constant 0 : index
    %96 = vector.load %arg13[%c0_49, %c0_50, %c0_51] : memref<2x1x64xf32, #tpu.memory_space<vmem>>, vector<1x1x64xf32>
    %97 = vector.shape_cast %96 : vector<1x1x64xf32> to vector<1x64xf32>
    %98 = vector.broadcast %97 : vector<1x64xf32> to vector<16x64xf32>
    %99 = arith.addf %95, %98 : vector<16x64xf32>
    %100 = math.absf %99 : vector<16x64xf32>
    %cst_52 = arith.constant 0.707106769 : f32
    %101 = vector.broadcast %cst_52 : f32 to vector<16x64xf32>
    %102 = arith.mulf %100, %101 : vector<16x64xf32>
    %cst_53 = arith.constant 0.000000e+00 : f32
    %103 = vector.broadcast %cst_53 : f32 to vector<16x64xf32>
    %104 = arith.cmpf oge, %99, %103 : vector<16x64xf32>
    %cst_54 = arith.constant 1.000000e+00 : f32
    %cst_55 = arith.constant -1.000000e+00 : f32
    %105 = vector.broadcast %cst_54 : f32 to vector<16x64xf32>
    %106 = vector.broadcast %cst_55 : f32 to vector<16x64xf32>
    %107 = arith.select %104, %105, %106 : vector<16x64xi1>, vector<16x64xf32>
    %cst_56 = arith.constant 0.327591091 : f32
    %108 = vector.broadcast %cst_56 : f32 to vector<16x64xf32>
    %109 = arith.mulf %108, %102 : vector<16x64xf32>
    %cst_57 = arith.constant 1.000000e+00 : f32
    %110 = vector.broadcast %cst_57 : f32 to vector<16x64xf32>
    %111 = arith.addf %110, %109 : vector<16x64xf32>
    %cst_58 = arith.constant 1.000000e+00 : f32
    %112 = vector.broadcast %cst_58 : f32 to vector<16x64xf32>
    %113 = arith.divf %112, %111 : vector<16x64xf32>
    %cst_59 = arith.constant 1.06140542 : f32
    %114 = vector.broadcast %cst_59 : f32 to vector<16x64xf32>
    %115 = arith.mulf %113, %114 : vector<16x64xf32>
    %cst_60 = arith.constant -1.45315206 : f32
    %116 = vector.broadcast %cst_60 : f32 to vector<16x64xf32>
    %117 = arith.addf %116, %115 : vector<16x64xf32>
    %118 = arith.mulf %113, %117 : vector<16x64xf32>
    %cst_61 = arith.constant 1.42141378 : f32
    %119 = vector.broadcast %cst_61 : f32 to vector<16x64xf32>
    %120 = arith.addf %119, %118 : vector<16x64xf32>
    %121 = arith.mulf %113, %120 : vector<16x64xf32>
    %cst_62 = arith.constant -0.284496725 : f32
    %122 = vector.broadcast %cst_62 : f32 to vector<16x64xf32>
    %123 = arith.addf %122, %121 : vector<16x64xf32>
    %124 = arith.mulf %113, %123 : vector<16x64xf32>
    %cst_63 = arith.constant 0.254829586 : f32
    %125 = vector.broadcast %cst_63 : f32 to vector<16x64xf32>
    %126 = arith.addf %125, %124 : vector<16x64xf32>
    %127 = arith.mulf %113, %126 : vector<16x64xf32>
    %cst_64 = arith.constant 0.000000e+00 : f32
    %128 = vector.broadcast %cst_64 : f32 to vector<16x64xf32>
    %129 = arith.subf %128, %102 : vector<16x64xf32>
    %130 = arith.mulf %129, %102 : vector<16x64xf32>
    %131 = math.exp %130 : vector<16x64xf32>
    %132 = arith.mulf %127, %131 : vector<16x64xf32>
    %cst_65 = arith.constant 1.000000e+00 : f32
    %133 = vector.broadcast %cst_65 : f32 to vector<16x64xf32>
    %134 = arith.subf %133, %132 : vector<16x64xf32>
    %135 = arith.mulf %107, %134 : vector<16x64xf32>
    %cst_66 = arith.constant 5.000000e-01 : f32
    %136 = vector.broadcast %cst_66 : f32 to vector<16x64xf32>
    %137 = arith.mulf %136, %99 : vector<16x64xf32>
    %cst_67 = arith.constant 1.000000e+00 : f32
    %138 = vector.broadcast %cst_67 : f32 to vector<16x64xf32>
    %139 = arith.addf %138, %135 : vector<16x64xf32>
    %140 = arith.mulf %137, %139 : vector<16x64xf32>
    %141 = arith.truncf %140 : vector<16x64xf32> to vector<16x64xbf16>
    %c0_68 = arith.constant 0 : index
    %c0_69 = arith.constant 0 : index
    %c0_70 = arith.constant 0 : index
    %142 = vector.load %arg14[%c0_68, %c0_69, %c0_70] : memref<2x64x32xbf16, #tpu.memory_space<vmem>>, vector<1x64x32xbf16>
    %143 = vector.shape_cast %142 : vector<1x64x32xbf16> to vector<64x32xbf16>
    %cst_71 = arith.constant dense<0.000000e+00> : vector<16x32xf32>
    %144 = tpu.matmul %141, %143, %cst_71 {dimension_numbers = #tpu.dot_dimension_numbers<[1], [0], [0], [1], [0, 0, 1, 1], [], []>} : vector<16x64xbf16>, vector<64x32xbf16>, vector<16x32xf32> -> vector<16x32xf32>
    %c0_72 = arith.constant 0 : index
    %c0_73 = arith.constant 0 : index
    %c0_74 = arith.constant 0 : index
    %145 = vector.load %arg15[%c0_72, %c0_73, %c0_74] : memref<2x1x32xf32, #tpu.memory_space<vmem>>, vector<1x1x32xf32>
    %146 = vector.shape_cast %145 : vector<1x1x32xf32> to vector<1x32xf32>
    %147 = vector.broadcast %146 : vector<1x32xf32> to vector<16x32xf32>
    %148 = arith.addf %144, %147 : vector<16x32xf32>
    %149 = arith.addf %91, %148 : vector<16x32xf32>
    %c0_75 = arith.constant 0 : index
    %c0_76 = arith.constant 0 : index
    %c0_77 = arith.constant 0 : index
    %150 = vector.load %arg16[%c0_75, %c0_76, %c0_77] : memref<2x1x32xf32, #tpu.memory_space<vmem>>, vector<1x1x32xf32>
    %151 = vector.shape_cast %150 : vector<1x1x32xf32> to vector<1x32xf32>
    %c0_78 = arith.constant 0 : index
    %c0_79 = arith.constant 0 : index
    %c0_80 = arith.constant 0 : index
    %152 = vector.load %arg17[%c0_78, %c0_79, %c0_80] : memref<2x1x32xf32, #tpu.memory_space<vmem>>, vector<1x1x32xf32>
    %153 = vector.shape_cast %152 : vector<1x1x32xf32> to vector<1x32xf32>
    %cst_81 = arith.constant dense<0.000000e+00> : vector<16xf32>
    %154 = vector.multi_reduction <add>, %149, %cst_81 [1] : vector<16x32xf32> to vector<16xf32>
    %155 = vector.shape_cast %154 : vector<16xf32> to vector<16x1xf32>
    %cst_82 = arith.constant 3.200000e+01 : f32
    %156 = vector.broadcast %cst_82 : f32 to vector<16x1xf32>
    %157 = arith.divf %155, %156 : vector<16x1xf32>
    %158 = vector.broadcast %157 : vector<16x1xf32> to vector<16x32xf32>
    %159 = arith.subf %149, %158 : vector<16x32xf32>
    %160 = arith.mulf %159, %159 : vector<16x32xf32>
    %cst_83 = arith.constant dense<0.000000e+00> : vector<16xf32>
    %161 = vector.multi_reduction <add>, %160, %cst_83 [1] : vector<16x32xf32> to vector<16xf32>
    %162 = vector.shape_cast %161 : vector<16xf32> to vector<16x1xf32>
    %cst_84 = arith.constant 3.200000e+01 : f32
    %163 = vector.broadcast %cst_84 : f32 to vector<16x1xf32>
    %164 = arith.divf %162, %163 : vector<16x1xf32>
    %165 = vector.broadcast %157 : vector<16x1xf32> to vector<16x32xf32>
    %166 = arith.subf %149, %165 : vector<16x32xf32>
    %cst_85 = arith.constant 9.99999996E-13 : f32
    %167 = vector.broadcast %cst_85 : f32 to vector<16x1xf32>
    %168 = arith.addf %164, %167 : vector<16x1xf32>
    %169 = math.rsqrt %168 : vector<16x1xf32>
    %170 = vector.broadcast %169 : vector<16x1xf32> to vector<16x32xf32>
    %171 = arith.mulf %166, %170 : vector<16x32xf32>
    %172 = vector.broadcast %151 : vector<1x32xf32> to vector<16x32xf32>
    %173 = arith.mulf %171, %172 : vector<16x32xf32>
    %174 = vector.broadcast %153 : vector<1x32xf32> to vector<16x32xf32>
    %175 = arith.addf %173, %174 : vector<16x32xf32>
    %c1 = arith.constant 1 : index
    %c0_86 = arith.constant 0 : index
    %c0_87 = arith.constant 0 : index
    %176 = vector.load %arg18[%c1, %c0_86, %c0_87] : memref<3x16x32xf32, #tpu.memory_space<vmem>>, vector<1x16x32xf32>
    %177 = vector.shape_cast %176 : vector<1x16x32xf32> to vector<16x32xf32>
    %178 = vector.shape_cast %175 : vector<16x32xf32> to vector<1x16x32xf32>
    tpu.vector_store %arg18[%c1, %c0_86, %c0_87], %178 {strides = array<i32>} : memref<3x16x32xf32, #tpu.memory_space<vmem>>, vector<1x16x32xf32>,
    %179 = arith.truncf %175 : vector<16x32xf32> to vector<16x32xbf16>
    %c1_88 = arith.constant 1 : index
    %c0_89 = arith.constant 0 : index
    %c0_90 = arith.constant 0 : index
    %180 = vector.load %arg5[%c1_88, %c0_89, %c0_90] : memref<2x32x96xbf16, #tpu.memory_space<vmem>>, vector<1x32x96xbf16>
    %181 = vector.shape_cast %180 : vector<1x32x96xbf16> to vector<32x96xbf16>
    %cst_91 = arith.constant dense<0.000000e+00> : vector<16x96xf32>
    %182 = tpu.matmul %179, %181, %cst_91 {dimension_numbers = #tpu.dot_dimension_numbers<[1], [0], [0], [1], [0, 0, 1, 1], [], []>} : vector<16x32xbf16>, vector<32x96xbf16>, vector<16x96xf32> -> vector<16x96xf32>
    %183 = vector.extract_strided_slice %182 {offsets = [0, 0], sizes = [16, 32], strides = [1, 1]} : vector<16x96xf32> to vector<16x32xf32>
    %184 = vector.extract_strided_slice %182 {offsets = [0, 32], sizes = [16, 32], strides = [1, 1]} : vector<16x96xf32> to vector<16x32xf32>
    %185 = vector.extract_strided_slice %182 {offsets = [0, 64], sizes = [16, 32], strides = [1, 1]} : vector<16x96xf32> to vector<16x32xf32>
    %c1_92 = arith.constant 1 : index
    %c0_93 = arith.constant 0 : index
    %c0_94 = arith.constant 0 : index
    %186 = vector.load %arg6[%c1_92, %c0_93, %c0_94] : memref<2x1x32xf32, #tpu.memory_space<vmem>>, vector<1x1x32xf32>
    %187 = vector.shape_cast %186 : vector<1x1x32xf32> to vector<1x32xf32>
    %188 = vector.broadcast %187 : vector<1x32xf32> to vector<16x32xf32>
    %189 = arith.addf %183, %188 : vector<16x32xf32>
    %c1_95 = arith.constant 1 : index
    %c0_96 = arith.constant 0 : index
    %c0_97 = arith.constant 0 : index
    %190 = vector.load %arg7[%c1_95, %c0_96, %c0_97] : memref<2x1x32xf32, #tpu.memory_space<vmem>>, vector<1x1x32xf32>
    %191 = vector.shape_cast %190 : vector<1x1x32xf32> to vector<1x32xf32>
    %192 = vector.broadcast %191 : vector<1x32xf32> to vector<16x32xf32>
    %193 = arith.addf %183, %192 : vector<16x32xf32>
    %194 = tpu.concatenate %189, %189, %189, %189 in 0 : vector<16x32xf32>, vector<16x32xf32>, vector<16x32xf32>, vector<16x32xf32> -> vector<64x32xf32>
    %195 = arith.mulf %194, %4 : vector<64x32xf32>
    %196 = tpu.concatenate %193, %193, %193, %193 in 0 : vector<16x32xf32>, vector<16x32xf32>, vector<16x32xf32>, vector<16x32xf32> -> vector<64x32xf32>
    %197 = arith.mulf %196, %4 : vector<64x32xf32>
    %198 = arith.truncf %195 : vector<64x32xf32> to vector<64x32xbf16>
    %199 = arith.truncf %184 : vector<16x32xf32> to vector<16x32xbf16>
    %cst_98 = arith.constant dense<0.000000e+00> : vector<64x16xf32>
    %200 = tpu.matmul %198, %199, %cst_98 {dimension_numbers = #tpu.dot_dimension_numbers<[1], [1], [0], [0], [0, 0, 1, 0], [], []>} : vector<64x32xbf16>, vector<16x32xbf16>, vector<64x16xf32> -> vector<64x16xf32>
    %201 = arith.truncf %197 : vector<64x32xf32> to vector<64x32xbf16>
    %c1_99 = arith.constant 1 : index
    %c0_100 = arith.constant 0 : index
    %c0_101 = arith.constant 0 : index
    %202 = vector.load %arg8[%c1_99, %c0_100, %c0_101] : memref<2x32x32xbf16, #tpu.memory_space<vmem>>, vector<1x32x32xbf16>
    %203 = vector.shape_cast %202 : vector<1x32x32xbf16> to vector<32x32xbf16>
    %cst_102 = arith.constant dense<0.000000e+00> : vector<64x32xf32>
    %204 = tpu.matmul %201, %203, %cst_102 {dimension_numbers = #tpu.dot_dimension_numbers<[1], [1], [0], [0], [0, 0, 1, 0], [], []>} : vector<64x32xbf16>, vector<32x32xbf16>, vector<64x32xf32> -> vector<64x32xf32>
    %205 = tpu.concatenate %204, %204, %204, %204, %204, %204, %204, %204 in 1 : vector<64x32xf32>, vector<64x32xf32>, vector<64x32xf32>, vector<64x32xf32>, vector<64x32xf32>, vector<64x32xf32>, vector<64x32xf32>, vector<64x32xf32> -> vector<64x256xf32>
    %206 = arith.mulf %205, %2 : vector<64x256xf32>
    %207 = arith.truncf %206 : vector<64x256xf32> to vector<64x256xbf16>
    %cst_103 = arith.constant dense<0.000000e+00> : vector<64x16xf32>
    %208 = tpu.matmul %207, %3, %cst_103 {dimension_numbers = #tpu.dot_dimension_numbers<[1], [0], [0], [1], [0, 0, 1, 1], [], []>} : vector<64x256xbf16>, vector<256x16xbf16>, vector<64x16xf32> -> vector<64x16xf32>
    %209 = arith.addf %200, %208 : vector<64x16xf32>
    %210 = arith.addf %209, %1 : vector<64x16xf32>
    %cst_104 = arith.constant dense<0xFF800000> : vector<64xf32>
    %211 = vector.multi_reduction <maximumf>, %210, %cst_104 [1] : vector<64x16xf32> to vector<64xf32>
    %212 = vector.shape_cast %211 : vector<64xf32> to vector<64x1xf32>
    %213 = vector.broadcast %212 : vector<64x1xf32> to vector<64x16xf32>
    %214 = arith.subf %210, %213 : vector<64x16xf32>
    %215 = math.exp %214 : vector<64x16xf32>
    %cst_105 = arith.constant dense<0.000000e+00> : vector<64xf32>
    %216 = vector.multi_reduction <add>, %215, %cst_105 [1] : vector<64x16xf32> to vector<64xf32>
    %217 = vector.shape_cast %216 : vector<64xf32> to vector<64x1xf32>
    %218 = tpu.reciprocal %217 {approx = true} : vector<64x1xf32> -> vector<64x1xf32>
    %219 = vector.broadcast %218 : vector<64x1xf32> to vector<64x16xf32>
    %220 = arith.mulf %215, %219 : vector<64x16xf32>
    %221 = arith.truncf %220 : vector<64x16xf32> to vector<64x16xbf16>
    %222 = arith.truncf %185 : vector<16x32xf32> to vector<16x32xbf16>
    %cst_106 = arith.constant dense<0.000000e+00> : vector<64x32xf32>
    %223 = tpu.matmul %221, %222, %cst_106 {dimension_numbers = #tpu.dot_dimension_numbers<[1], [0], [0], [1], [0, 0, 1, 1], [], []>} : vector<64x16xbf16>, vector<16x32xbf16>, vector<64x32xf32> -> vector<64x32xf32>
    %224 = arith.mulf %223, %4 : vector<64x32xf32>
    %225 = vector.extract_strided_slice %224 {offsets = [0, 0], sizes = [16, 32], strides = [1, 1]} : vector<64x32xf32> to vector<16x32xf32>
    %226 = vector.extract_strided_slice %224 {offsets = [16, 0], sizes = [16, 32], strides = [1, 1]} : vector<64x32xf32> to vector<16x32xf32>
    %227 = arith.addf %225, %226 : vector<16x32xf32>
    %228 = vector.extract_strided_slice %224 {offsets = [32, 0], sizes = [16, 32], strides = [1, 1]} : vector<64x32xf32> to vector<16x32xf32>
    %229 = arith.addf %227, %228 : vector<16x32xf32>
    %230 = vector.extract_strided_slice %224 {offsets = [48, 0], sizes = [16, 32], strides = [1, 1]} : vector<64x32xf32> to vector<16x32xf32>
    %231 = arith.addf %229, %230 : vector<16x32xf32>
    %232 = arith.truncf %231 : vector<16x32xf32> to vector<16x32xbf16>
    %c1_107 = arith.constant 1 : index
    %c0_108 = arith.constant 0 : index
    %c0_109 = arith.constant 0 : index
    %233 = vector.load %arg9[%c1_107, %c0_108, %c0_109] : memref<2x32x32xbf16, #tpu.memory_space<vmem>>, vector<1x32x32xbf16>
    %234 = vector.shape_cast %233 : vector<1x32x32xbf16> to vector<32x32xbf16>
    %cst_110 = arith.constant dense<0.000000e+00> : vector<16x32xf32>
    %235 = tpu.matmul %232, %234, %cst_110 {dimension_numbers = #tpu.dot_dimension_numbers<[1], [0], [0], [1], [0, 0, 1, 1], [], []>} : vector<16x32xbf16>, vector<32x32xbf16>, vector<16x32xf32> -> vector<16x32xf32>
    %236 = arith.addf %175, %235 : vector<16x32xf32>
    %c1_111 = arith.constant 1 : index
    %c0_112 = arith.constant 0 : index
    %c0_113 = arith.constant 0 : index
    %237 = vector.load %arg10[%c1_111, %c0_112, %c0_113] : memref<2x1x32xf32, #tpu.memory_space<vmem>>, vector<1x1x32xf32>
    %238 = vector.shape_cast %237 : vector<1x1x32xf32> to vector<1x32xf32>
    %c1_114 = arith.constant 1 : index
    %c0_115 = arith.constant 0 : index
    %c0_116 = arith.constant 0 : index
    %239 = vector.load %arg11[%c1_114, %c0_115, %c0_116] : memref<2x1x32xf32, #tpu.memory_space<vmem>>, vector<1x1x32xf32>
    %240 = vector.shape_cast %239 : vector<1x1x32xf32> to vector<1x32xf32>
    %cst_117 = arith.constant dense<0.000000e+00> : vector<16xf32>
    %241 = vector.multi_reduction <add>, %236, %cst_117 [1] : vector<16x32xf32> to vector<16xf32>
    %242 = vector.shape_cast %241 : vector<16xf32> to vector<16x1xf32>
    %cst_118 = arith.constant 3.200000e+01 : f32
    %243 = vector.broadcast %cst_118 : f32 to vector<16x1xf32>
    %244 = arith.divf %242, %243 : vector<16x1xf32>
    %245 = vector.broadcast %244 : vector<16x1xf32> to vector<16x32xf32>
    %246 = arith.subf %236, %245 : vector<16x32xf32>
    %247 = arith.mulf %246, %246 : vector<16x32xf32>
    %cst_119 = arith.constant dense<0.000000e+00> : vector<16xf32>
    %248 = vector.multi_reduction <add>, %247, %cst_119 [1] : vector<16x32xf32> to vector<16xf32>
    %249 = vector.shape_cast %248 : vector<16xf32> to vector<16x1xf32>
    %cst_120 = arith.constant 3.200000e+01 : f32
    %250 = vector.broadcast %cst_120 : f32 to vector<16x1xf32>
    %251 = arith.divf %249, %250 : vector<16x1xf32>
    %252 = vector.broadcast %244 : vector<16x1xf32> to vector<16x32xf32>
    %253 = arith.subf %236, %252 : vector<16x32xf32>
    %cst_121 = arith.constant 9.99999996E-13 : f32
    %254 = vector.broadcast %cst_121 : f32 to vector<16x1xf32>
    %255 = arith.addf %251, %254 : vector<16x1xf32>
    %256 = math.rsqrt %255 : vector<16x1xf32>
    %257 = vector.broadcast %256 : vector<16x1xf32> to vector<16x32xf32>
    %258 = arith.mulf %253, %257 : vector<16x32xf32>
    %259 = vector.broadcast %238 : vector<1x32xf32> to vector<16x32xf32>
    %260 = arith.mulf %258, %259 : vector<16x32xf32>
    %261 = vector.broadcast %240 : vector<1x32xf32> to vector<16x32xf32>
    %262 = arith.addf %260, %261 : vector<16x32xf32>
    %263 = arith.truncf %262 : vector<16x32xf32> to vector<16x32xbf16>
    %c1_122 = arith.constant 1 : index
    %c0_123 = arith.constant 0 : index
    %c0_124 = arith.constant 0 : index
    %264 = vector.load %arg12[%c1_122, %c0_123, %c0_124] : memref<2x32x64xbf16, #tpu.memory_space<vmem>>, vector<1x32x64xbf16>
    %265 = vector.shape_cast %264 : vector<1x32x64xbf16> to vector<32x64xbf16>
    %cst_125 = arith.constant dense<0.000000e+00> : vector<16x64xf32>
    %266 = tpu.matmul %263, %265, %cst_125 {dimension_numbers = #tpu.dot_dimension_numbers<[1], [0], [0], [1], [0, 0, 1, 1], [], []>} : vector<16x32xbf16>, vector<32x64xbf16>, vector<16x64xf32> -> vector<16x64xf32>
    %c1_126 = arith.constant 1 : index
    %c0_127 = arith.constant 0 : index
    %c0_128 = arith.constant 0 : index
    %267 = vector.load %arg13[%c1_126, %c0_127, %c0_128] : memref<2x1x64xf32, #tpu.memory_space<vmem>>, vector<1x1x64xf32>
    %268 = vector.shape_cast %267 : vector<1x1x64xf32> to vector<1x64xf32>
    %269 = vector.broadcast %268 : vector<1x64xf32> to vector<16x64xf32>
    %270 = arith.addf %266, %269 : vector<16x64xf32>
    %271 = math.absf %270 : vector<16x64xf32>
    %cst_129 = arith.constant 0.707106769 : f32
    %272 = vector.broadcast %cst_129 : f32 to vector<16x64xf32>
    %273 = arith.mulf %271, %272 : vector<16x64xf32>
    %cst_130 = arith.constant 0.000000e+00 : f32
    %274 = vector.broadcast %cst_130 : f32 to vector<16x64xf32>
    %275 = arith.cmpf oge, %270, %274 : vector<16x64xf32>
    %cst_131 = arith.constant 1.000000e+00 : f32
    %cst_132 = arith.constant -1.000000e+00 : f32
    %276 = vector.broadcast %cst_131 : f32 to vector<16x64xf32>
    %277 = vector.broadcast %cst_132 : f32 to vector<16x64xf32>
    %278 = arith.select %275, %276, %277 : vector<16x64xi1>, vector<16x64xf32>
    %cst_133 = arith.constant 0.327591091 : f32
    %279 = vector.broadcast %cst_133 : f32 to vector<16x64xf32>
    %280 = arith.mulf %279, %273 : vector<16x64xf32>
    %cst_134 = arith.constant 1.000000e+00 : f32
    %281 = vector.broadcast %cst_134 : f32 to vector<16x64xf32>
    %282 = arith.addf %281, %280 : vector<16x64xf32>
    %cst_135 = arith.constant 1.000000e+00 : f32
    %283 = vector.broadcast %cst_135 : f32 to vector<16x64xf32>
    %284 = arith.divf %283, %282 : vector<16x64xf32>
    %cst_136 = arith.constant 1.06140542 : f32
    %285 = vector.broadcast %cst_136 : f32 to vector<16x64xf32>
    %286 = arith.mulf %284, %285 : vector<16x64xf32>
    %cst_137 = arith.constant -1.45315206 : f32
    %287 = vector.broadcast %cst_137 : f32 to vector<16x64xf32>
    %288 = arith.addf %287, %286 : vector<16x64xf32>
    %289 = arith.mulf %284, %288 : vector<16x64xf32>
    %cst_138 = arith.constant 1.42141378 : f32
    %290 = vector.broadcast %cst_138 : f32 to vector<16x64xf32>
    %291 = arith.addf %290, %289 : vector<16x64xf32>
    %292 = arith.mulf %284, %291 : vector<16x64xf32>
    %cst_139 = arith.constant -0.284496725 : f32
    %293 = vector.broadcast %cst_139 : f32 to vector<16x64xf32>
    %294 = arith.addf %293, %292 : vector<16x64xf32>
    %295 = arith.mulf %284, %294 : vector<16x64xf32>
    %cst_140 = arith.constant 0.254829586 : f32
    %296 = vector.broadcast %cst_140 : f32 to vector<16x64xf32>
    %297 = arith.addf %296, %295 : vector<16x64xf32>
    %298 = arith.mulf %284, %297 : vector<16x64xf32>
    %cst_141 = arith.constant 0.000000e+00 : f32
    %299 = vector.broadcast %cst_141 : f32 to vector<16x64xf32>
    %300 = arith.subf %299, %273 : vector<16x64xf32>
    %301 = arith.mulf %300, %273 : vector<16x64xf32>
    %302 = math.exp %301 : vector<16x64xf32>
    %303 = arith.mulf %298, %302 : vector<16x64xf32>
    %cst_142 = arith.constant 1.000000e+00 : f32
    %304 = vector.broadcast %cst_142 : f32 to vector<16x64xf32>
    %305 = arith.subf %304, %303 : vector<16x64xf32>
    %306 = arith.mulf %278, %305 : vector<16x64xf32>
    %cst_143 = arith.constant 5.000000e-01 : f32
    %307 = vector.broadcast %cst_143 : f32 to vector<16x64xf32>
    %308 = arith.mulf %307, %270 : vector<16x64xf32>
    %cst_144 = arith.constant 1.000000e+00 : f32
    %309 = vector.broadcast %cst_144 : f32 to vector<16x64xf32>
    %310 = arith.addf %309, %306 : vector<16x64xf32>
    %311 = arith.mulf %308, %310 : vector<16x64xf32>
    %312 = arith.truncf %311 : vector<16x64xf32> to vector<16x64xbf16>
    %c1_145 = arith.constant 1 : index
    %c0_146 = arith.constant 0 : index
    %c0_147 = arith.constant 0 : index
    %313 = vector.load %arg14[%c1_145, %c0_146, %c0_147] : memref<2x64x32xbf16, #tpu.memory_space<vmem>>, vector<1x64x32xbf16>
    %314 = vector.shape_cast %313 : vector<1x64x32xbf16> to vector<64x32xbf16>
    %cst_148 = arith.constant dense<0.000000e+00> : vector<16x32xf32>
    %315 = tpu.matmul %312, %314, %cst_148 {dimension_numbers = #tpu.dot_dimension_numbers<[1], [0], [0], [1], [0, 0, 1, 1], [], []>} : vector<16x64xbf16>, vector<64x32xbf16>, vector<16x32xf32> -> vector<16x32xf32>
    %c1_149 = arith.constant 1 : index
    %c0_150 = arith.constant 0 : index
    %c0_151 = arith.constant 0 : index
    %316 = vector.load %arg15[%c1_149, %c0_150, %c0_151] : memref<2x1x32xf32, #tpu.memory_space<vmem>>, vector<1x1x32xf32>
    %317 = vector.shape_cast %316 : vector<1x1x32xf32> to vector<1x32xf32>
    %318 = vector.broadcast %317 : vector<1x32xf32> to vector<16x32xf32>
    %319 = arith.addf %315, %318 : vector<16x32xf32>
    %320 = arith.addf %262, %319 : vector<16x32xf32>
    %c1_152 = arith.constant 1 : index
    %c0_153 = arith.constant 0 : index
    %c0_154 = arith.constant 0 : index
    %321 = vector.load %arg16[%c1_152, %c0_153, %c0_154] : memref<2x1x32xf32, #tpu.memory_space<vmem>>, vector<1x1x32xf32>
    %322 = vector.shape_cast %321 : vector<1x1x32xf32> to vector<1x32xf32>
    %c1_155 = arith.constant 1 : index
    %c0_156 = arith.constant 0 : index
    %c0_157 = arith.constant 0 : index
    %323 = vector.load %arg17[%c1_155, %c0_156, %c0_157] : memref<2x1x32xf32, #tpu.memory_space<vmem>>, vector<1x1x32xf32>
    %324 = vector.shape_cast %323 : vector<1x1x32xf32> to vector<1x32xf32>
    %cst_158 = arith.constant dense<0.000000e+00> : vector<16xf32>
    %325 = vector.multi_reduction <add>, %320, %cst_158 [1] : vector<16x32xf32> to vector<16xf32>
    %326 = vector.shape_cast %325 : vector<16xf32> to vector<16x1xf32>
    %cst_159 = arith.constant 3.200000e+01 : f32
    %327 = vector.broadcast %cst_159 : f32 to vector<16x1xf32>
    %328 = arith.divf %326, %327 : vector<16x1xf32>
    %329 = vector.broadcast %328 : vector<16x1xf32> to vector<16x32xf32>
    %330 = arith.subf %320, %329 : vector<16x32xf32>
    %331 = arith.mulf %330, %330 : vector<16x32xf32>
    %cst_160 = arith.constant dense<0.000000e+00> : vector<16xf32>
    %332 = vector.multi_reduction <add>, %331, %cst_160 [1] : vector<16x32xf32> to vector<16xf32>
    %333 = vector.shape_cast %332 : vector<16xf32> to vector<16x1xf32>
    %cst_161 = arith.constant 3.200000e+01 : f32
    %334 = vector.broadcast %cst_161 : f32 to vector<16x1xf32>
    %335 = arith.divf %333, %334 : vector<16x1xf32>
    %336 = vector.broadcast %328 : vector<16x1xf32> to vector<16x32xf32>
    %337 = arith.subf %320, %336 : vector<16x32xf32>
    %cst_162 = arith.constant 9.99999996E-13 : f32
    %338 = vector.broadcast %cst_162 : f32 to vector<16x1xf32>
    %339 = arith.addf %335, %338 : vector<16x1xf32>
    %340 = math.rsqrt %339 : vector<16x1xf32>
    %341 = vector.broadcast %340 : vector<16x1xf32> to vector<16x32xf32>
    %342 = arith.mulf %337, %341 : vector<16x32xf32>
    %343 = vector.broadcast %322 : vector<1x32xf32> to vector<16x32xf32>
    %344 = arith.mulf %342, %343 : vector<16x32xf32>
    %345 = vector.broadcast %324 : vector<1x32xf32> to vector<16x32xf32>
    %346 = arith.addf %344, %345 : vector<16x32xf32>
    %c2 = arith.constant 2 : index
    %c0_163 = arith.constant 0 : index
    %c0_164 = arith.constant 0 : index
    %347 = vector.load %arg18[%c2, %c0_163, %c0_164] : memref<3x16x32xf32, #tpu.memory_space<vmem>>, vector<1x16x32xf32>
    %348 = vector.shape_cast %347 : vector<1x16x32xf32> to vector<16x32xf32>
    %349 = vector.shape_cast %346 : vector<16x32xf32> to vector<1x16x32xf32>
    tpu.vector_store %arg18[%c2, %c0_163, %c0_164], %349 {strides = array<i32>} : memref<3x16x32xf32, #tpu.memory_space<vmem>>, vector<1x16x32xf32>,
    return
  }
}

</mosaic_0001>

<bundles_post_ra>
// kernel: eq.38
= control target key start
LH: loop header
LB: loop body
LE: loop exit
PB: predicated region body
PF: predicated region fallthrough
CT: control target
= control target key end

     0   :  { %s37_s8 = smov 16   ;;  %s38_s9 = smov 32   ;;  %vm7_vm0 = vcmask 130048   ;;  %vm13_vm1 = vcmask 523648   ;;  %vm19_vm2 = vcmask 392448   ;;  %vm25_vm3 = vcmask 261248   ;;  %s55_s0 = inlined_call_operand.vmem [shape: s32[4,16], index: 0, kind: input, shape index: {}]   ;;  %s56_s1 = inlined_call_operand.vmem [shape: s32[64], index: 1, kind: output, shape index: {}]  }
   0x1   :  { %v4_v0 = vld [vmem:[%s55_s0] sm:$0xf]  ;;  %s36_s0 = smov 48  }
   0x2   :  { %5 = vst [vmem:[#allocation1] sm:$0xf] %v4_v0 }
   0x9   :  { %v10_v1 = vld [vmem:[#allocation1 + $0x3] sm:$0x1]   ;;  %v22_v2 = vld [vmem:[#allocation1 + $0x1] sm:$0x1]   ;;  %v16_v3 = vld [vmem:[#allocation1 + $0x2] sm:$0x1]  }
   0xa   :  { %11 = vrot.lane.b32.xlu0 %v10_v1, %s36_s0  ;;  %23 = vrot.lane.b32.xlu1 %v22_v2, %s37_s8  ;;  %v6_v4 = vld [vmem:[#allocation1] sm:$0x1]  }
   0xb   :  { %8 = vst.msk [vmem:[#allocation0] sm:$0x1] %vm7_vm0, %v6_v4  }
  0x12   :  { %17 = vrot.lane.b32.xlu0 %v16_v3, %s38_s9 }
  0x7c   :  { %v12_v5 = vpop.permute.xlu0 %11   ;;  %v24_v6 = vpop.permute.xlu1 %23  }
  0x7d   :  { %14 = vst.msk [vmem:[#allocation0] sm:$0x1] %vm13_vm1, %v12_v5  }
  0x84   :  { %v18_v7 = vpop.permute.xlu0 %17  }
  0x85   :  { %20 = vst.msk [vmem:[#allocation0] sm:$0x1] %vm19_vm2, %v18_v7  }
  0x86   :  { %26 = vst.msk [vmem:[#allocation0] sm:$0x1] %vm25_vm3, %v24_v6  }
  0x8d   :  { %v29_v8 = vld [vmem:[#allocation0] sm:$0x1] }
  0x8e   :  { %32 = vst [vmem:[%s56_s1] sm:$0x1] %v29_v8 }

// kernel: _lambda_.1
= control target key start
LH: loop header
LB: loop body
LE: loop exit
PB: predicated region body
PF: predicated region fallthrough
CT: control target
= control target key end

     0   :  { %s3453_s0 = inlined_call_operand.vmem [shape: f32[16,32], index: 0, kind: input, shape index: {}]   ;;  %s3454_s1 = inlined_call_operand.vmem [shape: f32[64,16], index: 1, kind: input, shape index: {}]   ;;  %s3455_s2 = inlined_call_operand.vmem [shape: f32[64,256], index: 2, kind: input, shape index: {}]   ;;  %s3456_s3 = inlined_call_operand.vmem [shape: bf16[256,16], index: 3, kind: input, shape index: {}]   ;;  %s3457_s4 = inlined_call_operand.vmem [shape: f32[64,32], index: 4, kind: input, shape index: {}]   ;;  %s3458_s5 = inlined_call_operand.vmem [shape: bf16[2,32,96], index: 5, kind: input, shape index: {}]   ;;  %s3459_s6 = inlined_call_operand.vmem [shape: f32[2,1,32], index: 6, kind: input, shape index: {}]   ;;  %s3460_s7 = inlined_call_operand.vmem [shape: f32[2,1,32], index: 7, kind: input, shape index: {}]   ;;  %s3461_s8 = inlined_call_operand.vmem [shape: bf16[2,32,32], index: 8, kind: input, shape index: {}]   ;;  %s3462_s9 = inlined_call_operand.vmem [shape: bf16[2,32,32], index: 9, kind: input, shape index: {}]   ;;  %s3463_s10 = inlined_call_operand.vmem [shape: f32[2,1,32], index: 10, kind: input, shape index: {}, may-alias: {10,16}]   ;;  %s3464_s11 = inlined_call_operand.vmem [shape: f32[2,1,32], index: 11, kind: input, shape index: {}, may-alias: {11,15,17}]   ;;  %s3465_s12 = inlined_call_operand.vmem [shape: bf16[2,32,64], index: 12, kind: input, shape index: {}]   ;;  %s3466_s13 = inlined_call_operand.vmem [shape: f32[2,1,64], index: 13, kind: input, shape index: {}]   ;;  %s3467_s14 = inlined_call_operand.vmem [shape: bf16[2,64,32], index: 14, kind: input, shape index: {}]   ;;  %s3468_s15 = inlined_call_operand.vmem [shape: f32[2,1,32], index: 15, kind: input, shape index: {}, may-alias: {11,15,17}]   ;;  %s3469_s16 = inlined_call_operand.vmem [shape: f32[2,1,32], index: 16, kind: input, shape index: {}, may-alias: {10,16}]   ;;  %s3470_s17 = inlined_call_operand.vmem [shape: f32[2,1,32], index: 17, kind: input, shape index: {}, may-alias: {11,15,17}]   ;;  %s3471_s18 = inlined_call_operand.hbm [shape: f32[3,16,32], index: 18, kind: output, shape index: {}]  }
   0x1   :  { %3475 = sst [smem:[#allocation5_spill]] %s3453_s0 }
   0x2   :  { %3476 = sst [smem:[#allocation6_spill]] %s3454_s1 }
   0x3   :  { %3477 = sst [smem:[#allocation7_spill]] %s3455_s2 }
   0x4   :  { %v2204_v0 = vld [vmem:[%s3458_s5 + $0x8] sm:$0xff]  ;;  %s3478_s0 = sld [smem:[#allocation5_spill]]  ;;  %vm127_vm0 = vcmask 261120   ;;  %v2203_v3 = vld [vmem:[%s3458_s5] sm:$0xff] }
   0x5   :  { %156 = vmatpush.bf16.msra.mxu0 %v2204_v0 }
   0x9   :  { %157 = vmatpush.bf16.msra.mxu0 %v2203_v3 }
   0xa   :  { %v2524_v1 = vld [vmem:[%s3478_s0] sm:$0xff]  ;;  %v2529_v2 = vld [vmem:[%s3478_s0 + $0x8] sm:$0xff] }
   0xb   :  { %128 = vst.msk [vmem:[#allocation2] sm:$0xff] %vm127_vm0, %v2524_v1  ;;  %v130_v4 = vpack.c.bf16 %v2529_v2, %v2524_v1 }
   0xc   :  { %129 = vst.msk [vmem:[#allocation2 + $0x8] sm:$0xff] %vm127_vm0, %v2529_v2 }
   0xd   :  { %23 = vsyncpa [#allocation3], 0  ;;  %1971 = vmatmul.msk.bf16.vlgmr.msra.gmra.mxu0 %vm127_vm0, %v130_v4  ;;  %v2206_v5 = vld [vmem:[%s3461_s8 + $0x8] sm:$0xff]  ;;  %v2205_v7 = vld [vmem:[%s3461_s8] sm:$0xff]  ;;  %s2415_s28 = smov 96   ;;  %s2416_s29 = smov 64  }
   0xe   :  { %v231_v6 = vsel %vm127_vm0, %v2206_v5, 0  ;;  %v228_v8 = vsel %vm127_vm0, %v2205_v7, 0  ;;  %v2236_v10 = vld [vmem:[%s3460_s7] ss:$0 sm:$0xff]  ;;  %v2565_v14 = vld [vmem:[%s3457_s4 + $0x8] sm:$0xff]  ;;  %v2574_v19 = vld [vmem:[%s3457_s4 + $0x18] sm:$0xff] }
   0xf   :  { %239 = vmatpush.bf16.xpose.msra.mxu1 %v231_v6  ;;  %v2560_v13 = vld [vmem:[%s3457_s4] sm:$0xff]  ;;  %v2579_v20 = vld [vmem:[%s3457_s4 + $0x10] sm:$0xff]  ;;  %v2587_v24 = vld [vmem:[%s3457_s4 + $0x28] sm:$0xff]  ;;  %s2417_s30 = smov 32   ;;  %vm350_vm1 = vcmask 523264   ;;  %vm359_vm2 = vcmask 785408  }
  0x10   :  { %v2592_v25 = vld [vmem:[%s3457_s4 + $0x20] sm:$0xff]  ;;  %v2600_v29 = vld [vmem:[%s3457_s4 + $0x38] sm:$0xff]  ;;  %v2605_v30 = vld [vmem:[%s3457_s4 + $0x30] sm:$0xff]  ;;  %s3479_s26 = sld [smem:[#allocation7_spill]]  ;;  %vm601_vm3 = vcmask 130048   ;;  %s1951_s21 = sshll.u32 %s3471_s18, 4  ;;  %s1952_s21 = int_to_ptr.hbm [resolvable:$true] %s1951_s21 }
  0x11   :  { %v2683_v43 = vld [vmem:[%s3456_s3 + $0x38] sm:$0xff]  ;;  %v2692_v45 = vld [vmem:[%s3456_s3 + $0x30] sm:$0xff]  ;;  %v2701_v47 = vld [vmem:[%s3456_s3 + $0x28] sm:$0xff]  ;;  %s3480_s0 = sld [smem:[#allocation6_spill]] }
  0x12   :  { %v2202_v44 = vld [vmem:[%s3456_s3 + $0x78] sm:$0xff]  ;;  %488 = vmatpush.bf16.msra.mxu2 %v2683_v43  ;;  %v2201_v46 = vld [vmem:[%s3456_s3 + $0x70] sm:$0xff]  ;;  %v2200_v48 = vld [vmem:[%s3456_s3 + $0x68] sm:$0xff] }
  0x13   :  { %517 = vmatpush.bf16.msra.mxu3 %v2202_v44  ;;  %v2710_v49 = vld [vmem:[%s3456_s3 + $0x20] sm:$0xff]  ;;  %v2719_v51 = vld [vmem:[%s3456_s3 + $0x18] sm:$0xff]  ;;  %v2728_v53 = vld [vmem:[%s3456_s3 + $0x10] sm:$0xff] }
  0x14   :  { %v2199_v50 = vld [vmem:[%s3456_s3 + $0x60] sm:$0xff]  ;;  %v2198_v52 = vld [vmem:[%s3456_s3 + $0x58] sm:$0xff]  ;;  %v2197_v54 = vld [vmem:[%s3456_s3 + $0x50] sm:$0xff] }
  0x15   :  { %v2737_v55 = vld [vmem:[%s3456_s3 + $0x8] sm:$0xff]  ;;  %v2746_v57 = vld [vmem:[%s3456_s3] sm:$0xff] }
  0x16   :  { %489 = vmatpush.bf16.msra.mxu2 %v2692_v45  ;;  %v2196_v56 = vld [vmem:[%s3456_s3 + $0x48] sm:$0xff]  ;;  %v2195_v58 = vld [vmem:[%s3456_s3 + $0x40] sm:$0xff]  ;;  %v73_v7 = vld [vmem:[%s3479_s26 + $0x10] sm:$0xff] }
  0x17   :  { %240 = vmatpush.bf16.xpose.msra.mxu1 %v228_v8  ;;  %518 = vmatpush.bf16.msra.mxu3 %v2201_v46  ;;  %v71_v5 = vld [vmem:[%s3479_s26] sm:$0xff] }
  0x1a   :  { %490 = vmatpush.bf16.msra.mxu2 %v2701_v47 }
  0x1b   :  { %519 = vmatpush.bf16.msra.mxu3 %v2200_v48 }
  0x1e   :  { %491 = vmatpush.bf16.msra.mxu2 %v2710_v49 }
  0x1f   :  { %520 = vmatpush.bf16.msra.mxu3 %v2199_v50 }
  0x22   :  { %492 = vmatpush.bf16.msra.mxu2 %v2719_v51 }
  0x23   :  { %521 = vmatpush.bf16.msra.mxu3 %v2198_v52 }
  0x26   :  { %493 = vmatpush.bf16.msra.mxu2 %v2728_v53 }
  0x27   :  { %522 = vmatpush.bf16.msra.mxu3 %v2197_v54 }
  0x2a   :  { %494 = vmatpush.bf16.msra.mxu2 %v2737_v55 }
  0x2b   :  { %523 = vmatpush.bf16.msra.mxu3 %v2196_v56  ;;  %v77_v56 = vld [vmem:[%s3479_s26 + $0x30] sm:$0xff] }
  0x2e   :  { %495 = vmatpush.bf16.msra.mxu2 %v2746_v57 }
  0x2f   :  { %524 = vmatpush.bf16.msra.mxu3 %v2195_v58 }
  0x8a   :  { %v2549_v9 = vpop.f32.mrf.mxu0 }
  0x8b   :  { %v174_v11 = vadd.f32 %v2236_v10, %v2549_v9 }
  0x8d   :  { %v184_v16 = vmul.f32 %v174_v11, %v2560_v13  ;;  %v186_v22 = vmul.f32 %v174_v11, %v2579_v20  ;;  %v188_v27 = vmul.f32 %v174_v11, %v2592_v25  ;;  %v190_v32 = vmul.f32 %v174_v11, %v2605_v30  ;;  %v74_v11 = vld [vmem:[%s3479_s26 + $0x18] sm:$0xff] }
  0x92   :  { %v2555_v12 = vpop.f32.mrf.mxu0 }
  0x93   :  { %v175_v15 = vadd.f32 %v2236_v10, %v2555_v12  ;;  %v2628_v36 = vpack.c.bf16 %v2555_v12, %v2549_v9  ;;  %v72_v10 = vld [vmem:[%s3479_s26 + $0x8] sm:$0xff] }
  0x95   :  { %v185_v17 = vmul.f32 %v175_v15, %v2565_v14  ;;  %v187_v21 = vmul.f32 %v175_v15, %v2574_v19  ;;  %v189_v26 = vmul.f32 %v175_v15, %v2587_v24  ;;  %v191_v31 = vmul.f32 %v175_v15, %v2600_v29 }
  0x97   :  { %v197_v18 = vpack.c.bf16 %v185_v17, %v184_v16  ;;  %v198_v23 = vpack.c.bf16 %v187_v21, %v186_v22  ;;  %v199_v28 = vpack.c.bf16 %v189_v26, %v188_v27  ;;  %v200_v33 = vpack.c.bf16 %v191_v31, %v190_v32  ;;  %v2235_v26 = vld [vmem:[%s3459_s6] ss:$0 sm:$0xff] }
  0x98   :  { %v2776_v31 = vadd.f32 %v2235_v26, %v2555_v12 }
  0x99   :  { %1980 = vmatmul.msk.bf16.vlgmr.msra.gmra.mxu1 %vm127_vm0, %v197_v18 }
  0x9a   :  { %v177_v44 = vmul.f32 %v2776_v31, %v2565_v14 }
  0xa9   :  { %1981 = vmatmul.msk.bf16.gmra.mxu1 %vm127_vm0, %v198_v23 }
  0xb9   :  { %1982 = vmatmul.msk.bf16.gmra.mxu1 %vm127_vm0, %v199_v28 }
  0xc9   :  { %1983 = vmatmul.msk.bf16.gmra.mxu1 %vm127_vm0, %v200_v33 }
 0x116   :  { %v2610_v34 = vpop.f32.mrf.mxu1 }
 0x117   :  { %318 = vrot.lane.b32.xlu2 %v2610_v34, %s2415_s28  ;;  %294 = vrot.lane.b32.xlu1 %v2610_v34, %s2416_s29 }
 0x118   :  { %270 = vrot.lane.b32.xlu0 %v2610_v34, %s2417_s30 }
 0x11e   :  { %v2618_v35 = vpop.f32.mrf.mxu1 }
 0x11f   :  { %320 = vrot.lane.b32.xlu2 %v2618_v35, %s2415_s28  ;;  %296 = vrot.lane.b32.xlu1 %v2618_v35, %s2416_s29 }
 0x120   :  { %272 = vrot.lane.b32.xlu0 %v2618_v35, %s2417_s30 }
 0x126   :  { %v2630_v37 = vpop.f32.mrf.mxu1 }
 0x127   :  { %274 = vrot.lane.b32.xlu1 %v2630_v37, %s2417_s30 }
 0x128   :  { %547 = vrot.lane.b32.xlu0 %v2628_v36, %s2415_s28 }
 0x12e   :  { %v2636_v38 = vpop.f32.mrf.mxu1 }
 0x12f   :  { %300 = vrot.lane.b32.xlu1 %v2636_v38, %s2416_s29  ;;  %276 = vrot.lane.b32.xlu2 %v2636_v38, %s2417_s30 }
 0x130   :  { %298 = vrot.lane.b32.xlu0 %v2630_v37, %s2416_s29 }
 0x136   :  { %v2644_v39 = vpop.f32.mrf.mxu1 }
 0x137   :  { %322 = vrot.lane.b32.xlu2 %v2630_v37, %s2415_s28  ;;  %278 = vrot.lane.b32.xlu1 %v2644_v39, %s2417_s30 }
 0x138   :  { %324 = vrot.lane.b32.xlu0 %v2636_v38, %s2415_s28 }
 0x13e   :  { %v2652_v40 = vpop.f32.mrf.mxu1 }
 0x13f   :  { %304 = vrot.lane.b32.xlu1 %v2652_v40, %s2416_s29  ;;  %280 = vrot.lane.b32.xlu2 %v2652_v40, %s2417_s30 }
 0x140   :  { %302 = vrot.lane.b32.xlu0 %v2644_v39, %s2416_s29 }
 0x146   :  { %v2660_v41 = vpop.f32.mrf.mxu1 }
 0x147   :  { %326 = vrot.lane.b32.xlu2 %v2644_v39, %s2415_s28  ;;  %282 = vrot.lane.b32.xlu1 %v2660_v41, %s2417_s30 }
 0x148   :  { %328 = vrot.lane.b32.xlu0 %v2652_v40, %s2415_s28 }
 0x14e   :  { %v2668_v42 = vpop.f32.mrf.mxu1 }
 0x14f   :  { %308 = vrot.lane.b32.xlu1 %v2668_v42, %s2416_s29  ;;  %284 = vrot.lane.b32.xlu2 %v2668_v42, %s2417_s30 }
 0x150   :  { %306 = vrot.lane.b32.xlu0 %v2660_v41, %s2416_s29 }
 0x157   :  { %330 = vrot.lane.b32.xlu2 %v2660_v41, %s2415_s28 }
 0x158   :  { %332 = vrot.lane.b32.xlu0 %v2668_v42, %s2415_s28 }
 0x171   :  { %v319_v59 = vpop.permute.xlu2 %318 }
 0x179   :  { %v321_v63 = vpop.permute.xlu2 %320 }
 0x189   :  { %v295_v60 = vpop.permute.xlu1 %294  ;;  %v277_v17 = vpop.permute.xlu2 %276 }
 0x18a   :  { %v271_v61 = vpop.permute.xlu0 %270  ;;  %v345_v58 = vsel %vm127_vm0, %v2636_v38, %v277_v17 }
 0x18b   :  { %v342_v62 = vsel %vm127_vm0, %v2610_v34, %v271_v61  ;;  %v2779_v34 = vadd.f32 %v2235_v26, %v2549_v9  ;;  %v81_v26 = vld [vmem:[%s3479_s26 + $0x50] sm:$0xff] }
 0x18c   :  { %v351_v0 = vsel %vm350_vm1, %v342_v62, %v295_v60  ;;  %v78_v60 = vld [vmem:[%s3479_s26 + $0x38] sm:$0xff]  ;;  %v76_v62 = vld [vmem:[%s3479_s26 + $0x28] sm:$0xff] }
 0x18d   :  { %v360_v8 = vsel %vm359_vm2, %v351_v0, %v319_v59  ;;  %v176_v46 = vmul.f32 %v2779_v34, %v2560_v13 }
 0x18e   :  { %v368_v18 = vmul.f32 %v360_v8, %v71_v5  ;;  %v369_v22 = vmul.f32 %v360_v8, %v72_v10  ;;  %v179_v8 = vmul.f32 %v2776_v31, %v2574_v19 }
 0x18f   :  { %v192_v12 = vpack.c.bf16 %v177_v44, %v176_v46 }
 0x191   :  { %v297_v3 = vpop.permute.xlu1 %296  ;;  %v323_v48 = vpop.permute.xlu2 %322 }
 0x192   :  { %v273_v4 = vpop.permute.xlu0 %272 }
 0x193   :  { %v343_v6 = vsel %vm127_vm0, %v2618_v35, %v273_v4 }
 0x194   :  { %v352_v15 = vsel %vm350_vm1, %v343_v6, %v297_v3 }
 0x195   :  { %v361_v16 = vsel %vm359_vm2, %v352_v15, %v321_v63  ;;  %v178_v15 = vmul.f32 %v2779_v34, %v2579_v20 }
 0x196   :  { %v370_v21 = vmul.f32 %v361_v16, %v73_v7  ;;  %v371_v23 = vmul.f32 %v361_v16, %v74_v11 }
 0x197   :  { %v193_v16 = vpack.c.bf16 %v179_v8, %v178_v15 }
 0x198   :  { %v384_v27 = vpack.c.bf16 %v370_v21, %v368_v18  ;;  %v385_v28 = vpack.c.bf16 %v371_v23, %v369_v22 }
 0x199   :  { %v275_v32 = vpop.permute.xlu1 %274  ;;  %v281_v63 = vpop.permute.xlu2 %280 }
 0x19a   :  { %496 = vmatmul.bf16.vlgmr.msra.gmra.mxu2 %v384_v27  ;;  %525 = vmatmul.bf16.vlgmr.msra.gmra.mxu3 %v385_v28  ;;  %v548_v33 = vpop.permute.xlu0 %547  ;;  %v344_v54 = vsel %vm127_vm0, %v2630_v37, %v275_v32  ;;  %v75_v37 = vld [vmem:[%s3479_s26 + $0x20] sm:$0xff]  ;;  %v347_v27 = vsel %vm127_vm0, %v2652_v40, %v281_v63  ;;  %v82_v32 = vld [vmem:[%s3479_s26 + $0x58] sm:$0xff] }
 0x19b   :  { %v562_v35 = vsel %vm127_vm0, %v548_v33, 0  ;;  %v79_v33 = vld [vmem:[%s3479_s26 + $0x40] sm:$0xff] }
 0x19c   :  { %571 = vmatpush.bf16.xpose.msrb.mxu0 %v562_v35 }
 0x1a1   :  { %v301_v50 = vpop.permute.xlu1 %300  ;;  %v327_v21 = vpop.permute.xlu2 %326 }
 0x1a2   :  { %v299_v52 = vpop.permute.xlu0 %298  ;;  %v354_v0 = vsel %vm350_vm1, %v345_v58, %v301_v50 }
 0x1a3   :  { %2048 = vmatmul.msk.bf16.vlgmr.msrb.gmra.mxu0 %vm127_vm0, %v192_v12  ;;  %v353_v9 = vsel %vm350_vm1, %v344_v54, %v299_v52  ;;  %v181_v54 = vmul.f32 %v2776_v31, %v2587_v24 }
 0x1a4   :  { %v362_v59 = vsel %vm359_vm2, %v353_v9, %v323_v48 }
 0x1a5   :  { %v372_v6 = vmul.f32 %v362_v59, %v75_v37  ;;  %v373_v7 = vmul.f32 %v362_v59, %v76_v62  ;;  %v180_v59 = vmul.f32 %v2779_v34, %v2592_v25 }
 0x1a9   :  { %v279_v61 = vpop.permute.xlu1 %278  ;;  %v285_v9 = vpop.permute.xlu2 %284 }
 0x1aa   :  { %v325_v3 = vpop.permute.xlu0 %324  ;;  %v346_v22 = vsel %vm127_vm0, %v2644_v39, %v279_v61  ;;  %v80_v39 = vld [vmem:[%s3479_s26 + $0x48] sm:$0xff] }
 0x1ab   :  { %v363_v38 = vsel %vm359_vm2, %v354_v0, %v325_v3  ;;  %v85_v3 = vld [vmem:[%s3479_s26 + $0x70] sm:$0xff] }
 0x1ac   :  { %v374_v4 = vmul.f32 %v363_v38, %v77_v56  ;;  %v375_v5 = vmul.f32 %v363_v38, %v78_v60  ;;  %v194_v60 = vpack.c.bf16 %v181_v54, %v180_v59  ;;  %v349_v38 = vsel %vm127_vm0, %v2668_v42, %v285_v9  ;;  %v65_v59 = vld [vmem:[%s3480_s0 + $0x10] sm:$0xff] }
 0x1ae   :  { %v386_v10 = vpack.c.bf16 %v374_v4, %v372_v6  ;;  %v387_v11 = vpack.c.bf16 %v375_v5, %v373_v7  ;;  %v86_v5 = vld [vmem:[%s3479_s26 + $0x78] sm:$0xff]  ;;  %v84_v6 = vld [vmem:[%s3479_s26 + $0x68] sm:$0xff] }
 0x1b0   :  { %501 = vmatmul.bf16.gmra.mxu2 %v386_v10  ;;  %530 = vmatmul.bf16.gmra.mxu3 %v387_v11 }
 0x1b1   :  { %v305_v18 = vpop.permute.xlu1 %304  ;;  %v331_v0 = vpop.permute.xlu2 %330 }
 0x1b2   :  { %v303_v17 = vpop.permute.xlu0 %302  ;;  %v356_v35 = vsel %vm350_vm1, %v347_v27, %v305_v18 }
 0x1b3   :  { %2049 = vmatmul.msk.bf16.gmra.mxu0 %vm127_vm0, %v193_v16  ;;  %v355_v23 = vsel %vm350_vm1, %v346_v22, %v303_v17  ;;  %v183_v17 = vmul.f32 %v2776_v31, %v2600_v29  ;;  %v182_v22 = vmul.f32 %v2779_v34, %v2605_v30 }
 0x1b4   :  { %v364_v28 = vsel %vm359_vm2, %v355_v23, %v327_v21 }
 0x1b5   :  { %v376_v50 = vmul.f32 %v364_v28, %v79_v33  ;;  %v377_v12 = vmul.f32 %v364_v28, %v80_v39  ;;  %v195_v23 = vpack.c.bf16 %v183_v17, %v182_v22  ;;  %v63_v33 = vld [vmem:[%s3480_s0] sm:$0xff] }
 0x1b9   :  { %v283_v52 = vpop.permute.xlu1 %282 }
 0x1ba   :  { %v329_v44 = vpop.permute.xlu0 %328  ;;  %v348_v37 = vsel %vm127_vm0, %v2660_v41, %v283_v52  ;;  %v83_v41 = vld [vmem:[%s3479_s26 + $0x60] sm:$0xff] }
 0x1bb   :  { %v365_v46 = vsel %vm359_vm2, %v356_v35, %v329_v44 }
 0x1bc   :  { %v378_v40 = vmul.f32 %v365_v46, %v81_v26  ;;  %v379_v48 = vmul.f32 %v365_v46, %v82_v32 }
 0x1be   :  { %v388_v56 = vpack.c.bf16 %v378_v40, %v376_v50  ;;  %v389_v58 = vpack.c.bf16 %v379_v48, %v377_v12  ;;  %v64_v48 = vld [vmem:[%s3480_s0 + $0x8] sm:$0xff] }
 0x1c0   :  { %506 = vmatmul.bf16.gmra.mxu2 %v388_v56  ;;  %535 = vmatmul.bf16.gmra.mxu3 %v389_v58 }
 0x1c1   :  { %v309_v63 = vpop.permute.xlu1 %308 }
 0x1c2   :  { %v307_v61 = vpop.permute.xlu0 %306  ;;  %v358_v7 = vsel %vm350_vm1, %v349_v38, %v309_v63  ;;  %v66_v38 = vld [vmem:[%s3480_s0 + $0x18] sm:$0xff] }
 0x1c3   :  { %2050 = vmatmul.msk.bf16.gmra.mxu0 %vm127_vm0, %v194_v60  ;;  %v357_v62 = vsel %vm350_vm1, %v348_v37, %v307_v61 }
 0x1c4   :  { %v366_v4 = vsel %vm359_vm2, %v357_v62, %v331_v0 }
 0x1c5   :  { %v380_v15 = vmul.f32 %v366_v4, %v83_v41  ;;  %v381_v16 = vmul.f32 %v366_v4, %v84_v6 }
 0x1ca   :  { %v333_v8 = vpop.permute.xlu0 %332 }
 0x1cb   :  { %v367_v10 = vsel %vm359_vm2, %v358_v7, %v333_v8 }
 0x1cc   :  { %v382_v42 = vmul.f32 %v367_v10, %v85_v3  ;;  %v383_v11 = vmul.f32 %v367_v10, %v86_v5 }
 0x1ce   :  { %v390_v18 = vpack.c.bf16 %v382_v42, %v380_v15  ;;  %v391_v21 = vpack.c.bf16 %v383_v11, %v381_v16  ;;  %v67_v42 = vld [vmem:[%s3480_s0 + $0x20] sm:$0xff] }
 0x1d0   :  { %511 = vmatmul.bf16.gmra.mxu2 %v390_v18  ;;  %540 = vmatmul.bf16.gmra.mxu3 %v391_v21 }
 0x1d3   :  { %2051 = vmatmul.msk.bf16.gmra.mxu0 %vm127_vm0, %v195_v23  ;;  %v68_v23 = vld [vmem:[%s3480_s0 + $0x28] sm:$0xff] }
 0x21d   :  { %v497_v26 = vpop.f32.mrf.mxu2  ;;  %v526_v27 = vpop.f32.mrf.mxu3 }
 0x21e   :  { %v527_v28 = vadd.f32 %v526_v27, %v497_v26 }
 0x220   :  { %v573_v32 = vpop.f32.mrf.mxu0 }
 0x221   :  { %v574_v39 = vadd.f32 %v573_v32, %v527_v28 }
 0x223   :  { %v2865_v31 = vadd.f32 %v574_v39, %v63_v33 }
 0x225   :  { %v499_v35 = vpop.f32.mrf.mxu2  ;;  %v528_v44 = vpop.f32.mrf.mxu3  ;;  %v602_v34 = vsel %vm601_vm3, %v2865_v31, -inf }
 0x226   :  { %v529_v46 = vadd.f32 %v528_v44, %v499_v35  ;;  %603 = vmax.xlane.f32.xlu1 %v602_v34  ;;  %v69_v44 = vld [vmem:[%s3480_s0 + $0x30] sm:$0xff] }
 0x228   :  { %v575_v40 = vpop.f32.mrf.mxu0 }
 0x229   :  { %v576_v50 = vadd.f32 %v575_v40, %v529_v46 }
 0x22b   :  { %v2872_v12 = vadd.f32 %v576_v50, %v64_v48 }
 0x22d   :  { %v605_v52 = vsel %vm601_vm3, %v2872_v12, -inf }
 0x22e   :  { %606 = vmax.xlane.f32.xlu2 %v605_v52 }
 0x230   :  { %v578_v54 = vpop.f32.mrf.mxu0 }
 0x233   :  { %v502_v9 = vpop.f32.mrf.mxu2  ;;  %v531_v56 = vpop.f32.mrf.mxu3 }
 0x234   :  { %v532_v58 = vadd.f32 %v531_v56, %v502_v9  ;;  %v70_v9 = vld [vmem:[%s3480_s0 + $0x38] sm:$0xff] }
 0x236   :  { %v579_v60 = vadd.f32 %v578_v54, %v532_v58 }
 0x238   :  { %v580_v61 = vpop.f32.mrf.mxu0  ;;  %v2879_v37 = vadd.f32 %v579_v60, %v65_v59 }
 0x23a   :  { %v608_v62 = vsel %vm601_vm3, %v2879_v37, -inf }
 0x23b   :  { %v504_v63 = vpop.f32.mrf.mxu2  ;;  %v533_v0 = vpop.f32.mrf.mxu3  ;;  %609 = vmax.xlane.f32.xlu0 %v608_v62 }
 0x23c   :  { %v534_v3 = vadd.f32 %v533_v0, %v504_v63 }
 0x23e   :  { %v581_v4 = vadd.f32 %v580_v61, %v534_v3 }
 0x240   :  { %v583_v5 = vpop.f32.mrf.mxu0  ;;  %v596_v41 = vadd.f32 %v581_v4, %v66_v38 }
 0x242   :  { %v611_v6 = vsel %vm601_vm3, %v596_v41, -inf }
 0x243   :  { %v507_v7 = vpop.f32.mrf.mxu2  ;;  %v536_v8 = vpop.f32.mrf.mxu3  ;;  %612 = vmax.xlane.f32.xlu2 %v611_v6 }
 0x244   :  { %v537_v10 = vadd.f32 %v536_v8, %v507_v7 }
 0x246   :  { %v584_v11 = vadd.f32 %v583_v5, %v537_v10 }
 0x248   :  { %v585_v15 = vpop.f32.mrf.mxu0  ;;  %v597_v16 = vadd.f32 %v584_v11, %v67_v42 }
 0x24a   :  { %v614_v17 = vsel %vm601_vm3, %v597_v16, -inf }
 0x24b   :  { %v509_v18 = vpop.f32.mrf.mxu2  ;;  %v538_v21 = vpop.f32.mrf.mxu3  ;;  %615 = vmax.xlane.f32.xlu1 %v614_v17 }
 0x24c   :  { %v539_v22 = vadd.f32 %v538_v21, %v509_v18 }
 0x24e   :  { %v586_v26 = vadd.f32 %v585_v15, %v539_v22 }
 0x250   :  { %v598_v27 = vadd.f32 %v586_v26, %v68_v23  ;;  %v588_v28 = vpop.f32.mrf.mxu0 }
 0x252   :  { %v617_v32 = vsel %vm601_vm3, %v598_v27, -inf }
 0x253   :  { %v512_v33 = vpop.f32.mrf.mxu2  ;;  %v541_v39 = vpop.f32.mrf.mxu3  ;;  %618 = vmax.xlane.f32.xlu2 %v617_v32 }
 0x254   :  { %v542_v35 = vadd.f32 %v541_v39, %v512_v33 }
 0x256   :  { %v589_v34 = vadd.f32 %v588_v28, %v542_v35 }
 0x258   :  { %v599_v46 = vadd.f32 %v589_v34, %v69_v44  ;;  %v590_v54 = vpop.f32.mrf.mxu0 }
 0x25a   :  { %v620_v40 = vsel %vm601_vm3, %v599_v46, -inf }
 0x25b   :  { %v514_v48 = vpop.f32.mrf.mxu2  ;;  %v543_v50 = vpop.f32.mrf.mxu3  ;;  %621 = vmax.xlane.f32.xlu0 %v620_v40 }
 0x25c   :  { %v544_v52 = vadd.f32 %v543_v50, %v514_v48 }
 0x25e   :  { %v591_v56 = vadd.f32 %v590_v54, %v544_v52 }
 0x260   :  { %v600_v58 = vadd.f32 %v591_v56, %v70_v9 }
 0x262   :  { %v623_v59 = vsel %vm601_vm3, %v600_v58, -inf }
 0x263   :  { %624 = vmax.xlane.f32.xlu1 %v623_v59 }
 0x27c   :  { %694 = vrot.lane.b32.xlu1 %v2628_v36, %s2416_s29 }
 0x299   :  { %v604_v60 = vpop.xlane.xlu1 %603 }
 0x29a   :  { %v626_v61 = vsub.f32 %v2865_v31, %v604_v60 }
 0x29c   :  { %v634_v62 = vmul.f32 1.442695, %v626_v61 }
 0x29e   :  { %2251 = vpow2.f32 %v634_v62 }
 0x2a1   :  { %v607_v63 = vpop.xlane.xlu2 %606 }
 0x2a2   :  { %v627_v0 = vsub.f32 %v2872_v12, %v607_v63 }
 0x2a4   :  { %v2252_v3 = vpop.eup %2251  ;;  %v636_v38 = vmul.f32 1.442695, %v627_v0 }
 0x2a5   :  { %v650_v4 = vsel %vm601_vm3, %v2252_v3, 0.0 }
 0x2a6   :  { %2253 = vpow2.f32 %v636_v38  ;;  %651 = vadd.xlane.f32.xlu2 %v650_v4 }
 0x2ac   :  { %v2254_v5 = vpop.eup %2253 }
 0x2ad   :  { %v653_v6 = vsel %vm601_vm3, %v2254_v5, 0.0 }
 0x2ae   :  { %v610_v7 = vpop.xlane.xlu0 %609  ;;  %654 = vadd.xlane.f32.xlu0 %v653_v6 }
 0x2af   :  { %v628_v36 = vsub.f32 %v2879_v37, %v610_v7 }
 0x2b1   :  { %v638_v8 = vmul.f32 1.442695, %v628_v36 }
 0x2b3   :  { %2255 = vpow2.f32 %v638_v8 }
 0x2b6   :  { %v613_v31 = vpop.xlane.xlu2 %612 }
 0x2b7   :  { %v629_v10 = vsub.f32 %v596_v41, %v613_v31 }
 0x2b9   :  { %v2256_v42 = vpop.eup %2255  ;;  %v640_v11 = vmul.f32 1.442695, %v629_v10 }
 0x2ba   :  { %v656_v12 = vsel %vm601_vm3, %v2256_v42, 0.0 }
 0x2bb   :  { %2257 = vpow2.f32 %v640_v11  ;;  %657 = vadd.xlane.f32.xlu2 %v656_v12 }
 0x2be   :  { %v616_v15 = vpop.xlane.xlu1 %615 }
 0x2bf   :  { %v630_v17 = vsub.f32 %v597_v16, %v616_v15 }
 0x2c1   :  { %v2258_v18 = vpop.eup %2257  ;;  %v642_v21 = vmul.f32 1.442695, %v630_v17 }
 0x2c2   :  { %v659_v22 = vsel %vm601_vm3, %v2258_v18, 0.0 }
 0x2c3   :  { %2259 = vpow2.f32 %v642_v21  ;;  %660 = vadd.xlane.f32.xlu0 %v659_v22 }
 0x2c6   :  { %v619_v23 = vpop.xlane.xlu2 %618 }
 0x2c7   :  { %v631_v37 = vsub.f32 %v598_v27, %v619_v23 }
 0x2c9   :  { %v2260_v26 = vpop.eup %2259  ;;  %v644_v28 = vmul.f32 1.442695, %v631_v37 }
 0x2ca   :  { %v662_v41 = vsel %vm601_vm3, %v2260_v26, 0.0 }
 0x2cb   :  { %2261 = vpow2.f32 %v644_v28  ;;  %663 = vadd.xlane.f32.xlu2 %v662_v41 }
 0x2ce   :  { %v622_v32 = vpop.xlane.xlu0 %621 }
 0x2cf   :  { %v632_v33 = vsub.f32 %v599_v46, %v622_v32  ;;  %v2207_v32 = vld [vmem:[%s3462_s9] sm:$0xff] }
 0x2d1   :  { %v2262_v39 = vpop.eup %2261  ;;  %v646_v35 = vmul.f32 1.442695, %v632_v33 }
 0x2d2   :  { %v665_v16 = vsel %vm601_vm3, %v2262_v39, 0.0 }
 0x2d3   :  { %2263 = vpow2.f32 %v646_v35  ;;  %666 = vadd.xlane.f32.xlu0 %v665_v16 }
 0x2d6   :  { %v625_v44 = vpop.xlane.xlu1 %624 }
 0x2d7   :  { %v633_v34 = vsub.f32 %v600_v58, %v625_v44 }
 0x2d9   :  { %v2264_v40 = vpop.eup %2263  ;;  %v648_v48 = vmul.f32 1.442695, %v633_v34 }
 0x2da   :  { %v668_v27 = vsel %vm601_vm3, %v2264_v40, 0.0 }
 0x2db   :  { %2265 = vpow2.f32 %v648_v48  ;;  %669 = vadd.xlane.f32.xlu2 %v668_v27 }
 0x2e1   :  { %v2266_v50 = vpop.eup %2265 }
 0x2e2   :  { %v671_v52 = vsel %vm601_vm3, %v2266_v50, 0.0 }
 0x2e3   :  { %672 = vadd.xlane.f32.xlu0 %v671_v52 }
 0x2ee   :  { %v695_v54 = vpop.permute.xlu1 %694 }
 0x2ef   :  { %716 = vmatpush.bf16.msrb.mxu1 %v695_v54 }
 0x319   :  { %v652_v46 = vpop.xlane.xlu2 %651 }
 0x31a   :  { %2267 = vrcp.f32 %v652_v46 }
 0x320   :  { %v2268_v56 = vpop.eup %2267 }
 0x321   :  { %v655_v9 = vpop.xlane.xlu0 %654  ;;  %v682_v60 = vmul.f32 %v2268_v56, %v2252_v3 }
 0x322   :  { %2269 = vrcp.f32 %v655_v9 }
 0x328   :  { %v2270_v59 = vpop.eup %2269 }
 0x329   :  { %v683_v58 = vmul.f32 %v2270_v59, %v2254_v5 }
 0x32b   :  { %v690_v61 = vpack.c.bf16 %v683_v58, %v682_v60 }
 0x32d   :  { %2052 = vmatmul.msk.bf16.vlgmr.msrb.gmra.mxu1 %vm601_vm3, %v690_v61  ;;  %v2418_v61 = vmov 32.0  }
 0x32e   :  { %v658_v62 = vpop.xlane.xlu2 %657 }
 0x32f   :  { %2271 = vrcp.f32 %v658_v62 }
 0x335   :  { %v2272_v0 = vpop.eup %2271 }
 0x336   :  { %v661_v63 = vpop.xlane.xlu0 %660  ;;  %v684_v4 = vmul.f32 %v2272_v0, %v2256_v42 }
 0x337   :  { %2273 = vrcp.f32 %v661_v63 }
 0x33d   :  { %v2274_v38 = vpop.eup %2273 }
 0x33e   :  { %v685_v6 = vmul.f32 %v2274_v38, %v2258_v18  ;;  %v664_v36 = vpop.xlane.xlu2 %663 }
 0x33f   :  { %2275 = vrcp.f32 %v664_v36 }
 0x340   :  { %v691_v7 = vpack.c.bf16 %v685_v6, %v684_v4 }
 0x342   :  { %2053 = vmatmul.msk.bf16.gmra.mxu1 %vm601_vm3, %v691_v7 }
 0x345   :  { %v2276_v3 = vpop.eup %2275 }
 0x346   :  { %v667_v8 = vpop.xlane.xlu0 %666  ;;  %v686_v31 = vmul.f32 %v2276_v3, %v2260_v26  ;;  %v2208_v26 = vld [vmem:[%s3462_s9 + $0x8] sm:$0xff] }
 0x347   :  { %2277 = vrcp.f32 %v667_v8  ;;  %778 = vmatpush.bf16.msra.mxu0 %v2208_v26 }
 0x34b   :  { %779 = vmatpush.bf16.msra.mxu0 %v2207_v32 }
 0x34d   :  { %v2278_v5 = vpop.eup %2277 }
 0x34e   :  { %v687_v10 = vmul.f32 %v2278_v5, %v2262_v39  ;;  %v670_v12 = vpop.xlane.xlu2 %669 }
 0x34f   :  { %2279 = vrcp.f32 %v670_v12 }
 0x350   :  { %v692_v11 = vpack.c.bf16 %v687_v10, %v686_v31 }
 0x352   :  { %2054 = vmatmul.msk.bf16.gmra.mxu1 %vm601_vm3, %v692_v11  ;;  %v2210_v11 = vld [vmem:[%s3465_s12 + $0x8] sm:$0xff] }
 0x353   :  { %881 = vmatpush.bf16.msrb.mxu3 %v2210_v11 }
 0x355   :  { %v2280_v42 = vpop.eup %2279 }
 0x356   :  { %v673_v15 = vpop.xlane.xlu0 %672  ;;  %v688_v18 = vmul.f32 %v2280_v42, %v2264_v40 }
 0x357   :  { %2281 = vrcp.f32 %v673_v15  ;;  %v2209_v15 = vld [vmem:[%s3465_s12] sm:$0xff] }
 0x358   :  { %2283 = vrcp.f32 %v2418_v61  ;;  %882 = vmatpush.bf16.msrb.mxu3 %v2209_v15 }
 0x35d   :  { %v2282_v17 = vpop.eup %2281 }
 0x35e   :  { %v689_v21 = vmul.f32 %v2282_v17, %v2266_v50 }
 0x360   :  { %v693_v22 = vpack.c.bf16 %v689_v21, %v688_v18 }
 0x362   :  { %2055 = vmatmul.msk.bf16.gmra.mxu1 %vm601_vm3, %v693_v22 }
 0x3aa   :  { %v718_v23 = vpop.f32.mrf.mxu1 }
 0x3ab   :  { %v738_v34 = vmul.f32 %v718_v23, %v2560_v13 }
 0x3b2   :  { %v720_v37 = vpop.f32.mrf.mxu1 }
 0x3b3   :  { %v739_v40 = vmul.f32 %v720_v37, %v2565_v14 }
 0x3bf   :  { %v723_v28 = vpop.f32.mrf.mxu1 }
 0x3c0   :  { %v740_v16 = vmul.f32 %v723_v28, %v2579_v20 }
 0x3c2   :  { %v746_v50 = vadd.f32 %v740_v16, %v738_v34 }
 0x3c7   :  { %v725_v41 = vpop.f32.mrf.mxu1 }
 0x3c8   :  { %v741_v44 = vmul.f32 %v725_v41, %v2574_v19 }
 0x3ca   :  { %v747_v52 = vadd.f32 %v741_v44, %v739_v40 }
 0x3cf   :  { %v728_v33 = vpop.f32.mrf.mxu1 }
 0x3d0   :  { %v742_v48 = vmul.f32 %v728_v33, %v2592_v25 }
 0x3d2   :  { %v748_v9 = vadd.f32 %v746_v50, %v742_v48  ;;  %v2237_v48 = vld [vmem:[%s3463_s10] ss:$0 sm:$0xff] }
 0x3d7   :  { %v730_v39 = vpop.f32.mrf.mxu1 }
 0x3d8   :  { %v743_v27 = vmul.f32 %v730_v39, %v2587_v24 }
 0x3da   :  { %v749_v56 = vadd.f32 %v747_v52, %v743_v27 }
 0x3df   :  { %v733_v35 = vpop.f32.mrf.mxu1 }
 0x3e0   :  { %v744_v54 = vmul.f32 %v733_v35, %v2605_v30 }
 0x3e2   :  { %v750_v20 = vadd.f32 %v748_v9, %v744_v54 }
 0x3e7   :  { %v735_v46 = vpop.f32.mrf.mxu1 }
 0x3e8   :  { %v745_v59 = vmul.f32 %v735_v46, %v2600_v29  ;;  %v2284_v29 = vpop.eup %2283  ;;  %v2238_v46 = vld [vmem:[%s3464_s11] ss:$0 sm:$0xff] }
 0x3e9   :  { %v797_v62 = vmul.f32 32.0, %v2284_v29  ;;  %vm801_vm4 = vweird.f32 %v2284_v29 }
 0x3ea   :  { %v751_v60 = vadd.f32 %v749_v56, %v745_v59 }
 0x3eb   :  { %v798_v63 = vsub.f32 1.0, %v797_v62 }
 0x3ec   :  { %v752_v19 = vpack.c.bf16 %v751_v60, %v750_v20  ;;  %v2239_v60 = vld [vmem:[%s3466_s13] ss:$0 sm:$0xff] }
 0x3ed   :  { %v799_v0 = vmul.f32 %v2284_v29, %v798_v63 }
 0x3ee   :  { %2064 = vmatmul.msk.bf16.vlgmr.msra.gmra.mxu0 %vm127_vm0, %v752_v19 }
 0x3ef   :  { %v800_v38 = vadd.f32 %v2284_v29, %v799_v0 }
 0x3f1   :  { %v2939_v4 = vsel %vm801_vm4, %v2284_v29, %v800_v38 }
 0x46b   :  { %v781_v13 = vpop.f32.mrf.mxu0 }
 0x46c   :  { %v786_v14 = vadd.f32 %v781_v13, %v2524_v1 }
 0x46e   :  { %v790_v25 = vsel %vm127_vm0, %v786_v14, 0.0 }
 0x46f   :  { %791 = vadd.xlane.f32.xlu1 %v790_v25 }
 0x473   :  { %v783_v24 = vpop.f32.mrf.mxu0 }
 0x474   :  { %v787_v58 = vadd.f32 %v783_v24, %v2529_v2 }
 0x476   :  { %v793_v30 = vsel %vm127_vm0, %v787_v58, 0.0 }
 0x477   :  { %794 = vadd.xlane.f32.xlu2 %v793_v30 }
 0x4e2   :  { %v792_v1 = vpop.xlane.xlu1 %791 }
 0x4e3   :  { %v803_v6 = vmul.f32 %v2939_v4, %v792_v1 }
 0x4e5   :  { %v805_v7 = vsub.f32 %v786_v14, %v803_v6  ;;  %v2214_v6 = vld [vmem:[%s3467_s14 + $0x18] sm:$0xff] }
 0x4e6   :  { %1013 = vmatpush.bf16.msra.mxu3 %v2214_v6 }
 0x4e7   :  { %v807_v36 = vmul.f32 %v805_v7, %v805_v7 }
 0x4e9   :  { %v809_v2 = vsel %vm127_vm0, %v807_v36, 0.0 }
 0x4ea   :  { %810 = vadd.xlane.f32.xlu0 %v809_v2  ;;  %v795_v8 = vpop.xlane.xlu2 %794 }
 0x4eb   :  { %v804_v3 = vmul.f32 %v2939_v4, %v795_v8 }
 0x4ed   :  { %v806_v5 = vsub.f32 %v787_v58, %v804_v3  ;;  %v2213_v3 = vld [vmem:[%s3467_s14 + $0x10] sm:$0xff] }
 0x4ee   :  { %1014 = vmatpush.bf16.msra.mxu3 %v2213_v3 }
 0x4ef   :  { %v808_v31 = vmul.f32 %v806_v5, %v806_v5 }
 0x4f1   :  { %v812_v10 = vsel %vm127_vm0, %v808_v31, 0.0 }
 0x4f2   :  { %813 = vadd.xlane.f32.xlu2 %v812_v10 }
 0x55d   :  { %v811_v12 = vpop.xlane.xlu0 %810 }
 0x55e   :  { %v815_v42 = vmul.f32 %v811_v12, %v2939_v4 }
 0x560   :  { %v817_v17 = vadd.f32 1e-12, %v815_v42  ;;  %v2212_v42 = vld [vmem:[%s3467_s14 + $0x8] sm:$0xff] }
 0x561   :  { %1015 = vmatpush.bf16.msra.mxu3 %v2212_v42 }
 0x562   :  { %2285 = vrsqrt.f32 %v817_v17  ;;  %vm825_vm6 = vweird.f32 %v817_v17 }
 0x565   :  { %v814_v18 = vpop.xlane.xlu2 %813 }
 0x566   :  { %v816_v21 = vmul.f32 %v814_v18, %v2939_v4 }
 0x568   :  { %v2286_v22 = vpop.eup %2285  ;;  %v818_v23 = vadd.f32 1e-12, %v816_v21 }
 0x569   :  { %v820_v37 = vmul.f32 %v2286_v22, %v817_v17  ;;  %vm826_vm5 = vweird.f32 %v2286_v22 }
 0x56a   :  { %2287 = vrsqrt.f32 %v818_v23  ;;  %vm827_vm7 = vmor %vm825_vm6, %vm826_vm5  ;;  %vm835_vm9 = vweird.f32 %v818_v23 }
 0x56b   :  { %v821_v28 = vmul.f32 %v2286_v22, %v820_v37 }
 0x56d   :  { %v822_v26 = vmul.f32 0.5, %v821_v28 }
 0x56f   :  { %v823_v41 = vsub.f32 1.5, %v822_v26  ;;  %v2211_v26 = vld [vmem:[%s3467_s14] sm:$0xff] }
 0x570   :  { %v2288_v32 = vpop.eup %2287  ;;  %1016 = vmatpush.bf16.msra.mxu3 %v2211_v26 }
 0x571   :  { %v824_v33 = vmul.f32 %v2286_v22, %v823_v41  ;;  %v830_v39 = vmul.f32 %v2288_v32, %v818_v23  ;;  %vm836_vm8 = vweird.f32 %v2288_v32 }
 0x572   :  { %vm837_vm10 = vmor %vm835_vm9, %vm836_vm8 }
 0x573   :  { %v831_v35 = vmul.f32 %v2288_v32, %v830_v39  ;;  %v828_v16 = vsel %vm827_vm7, %v2286_v22, %v824_v33 }
 0x574   :  { %v839_v40 = vmul.f32 %v828_v16, %v805_v7 }
 0x575   :  { %v832_v44 = vmul.f32 0.5, %v831_v35 }
 0x576   :  { %v844_v54 = vmul.f32 %v2237_v48, %v839_v40 }
 0x577   :  { %v833_v34 = vsub.f32 1.5, %v832_v44 }
 0x578   :  { %v2959_v56 = vadd.f32 %v2238_v46, %v844_v54 }
 0x579   :  { %v834_v27 = vmul.f32 %v2288_v32, %v833_v34 }
 0x57b   :  { %v838_v50 = vsel %vm837_vm10, %v2288_v32, %v834_v27 }
 0x57c   :  { %v840_v52 = vmul.f32 %v838_v50, %v806_v5 }
 0x57e   :  { %v845_v9 = vmul.f32 %v2237_v48, %v840_v52 }
 0x580   :  { %v2961_v59 = vadd.f32 %v2238_v46, %v845_v9 }
 0x582   :  { %v851_v20 = vpack.c.bf16 %v2961_v59, %v2959_v56 }
 0x584   :  { %2073 = vmatmul.msk.bf16.vlgmr.msrb.gmra.mxu3 %vm127_vm0, %v851_v20 }
 0x585   :  { %1348 = vmatpush.bf16.msrb.mxu3 %v2683_v43 }
 0x589   :  { %1349 = vmatpush.bf16.msrb.mxu3 %v2692_v45 }
 0x58d   :  { %1350 = vmatpush.bf16.msrb.mxu3 %v2701_v47  ;;  %v2419_v47 = vmov -1.0  }
 0x591   :  { %1351 = vmatpush.bf16.msrb.mxu3 %v2710_v49 }
 0x595   :  { %1352 = vmatpush.bf16.msrb.mxu3 %v2719_v51 }
 0x599   :  { %1353 = vmatpush.bf16.msrb.mxu3 %v2728_v53 }
 0x59d   :  { %1354 = vmatpush.bf16.msrb.mxu3 %v2737_v55 }
 0x5a1   :  { %1355 = vmatpush.bf16.msrb.mxu3 %v2746_v57 }
 0x607   :  { %v884_v19 = vpop.f32.mrf.mxu3 }
 0x608   :  { %v2969_v13 = vadd.f32 %v2239_v60, %v884_v19 }
 0x60a   :  { %v889_v14 = vand.u32 2147483647, %v2969_v13  ;;  %vm893_vm7 = vcmp.ge.f32.partialorder %v2969_v13, 0.0 }
 0x60c   :  { %v891_v25 = vmul.f32 0.70710677, %v889_v14 }
 0x60e   :  { %v897_v24 = vmul.f32 0.3275911, %v891_v25  ;;  %v949_v18 = vsub.f32 0.0, %v891_v25 }
 0x60f   :  { %v886_v58 = vpop.f32.mrf.mxu3 }
 0x610   :  { %v899_v30 = vadd.f32 1.0, %v897_v24  ;;  %v2972_v61 = vadd.f32 %v2239_v60, %v886_v58  ;;  %v951_v32 = vmul.f32 %v949_v18, %v891_v25 }
 0x612   :  { %2289 = vrcp.f32 %v899_v30  ;;  %v890_v29 = vand.u32 2147483647, %v2972_v61  ;;  %v912_v36 = vand.u32 2147483648, %v899_v30  ;;  %v910_v8 = vand.u32 2147483647, %v899_v30 }
 0x613   :  { %vm906_vm12 = vweird.f32 %v899_v30  ;;  %v953_v34 = vmul.f32 1.442695, %v951_v32  ;;  %vm894_vm8 = vcmp.ge.f32.partialorder %v2972_v61, 0.0 }
 0x614   :  { %v892_v62 = vmul.f32 0.70710677, %v890_v29  ;;  %v913_v31 = vor.u32 1.1754944e-38, %v912_v36  ;;  %vm911_vm14 = vcmp.eq.f32.partialorder %v910_v8, 8.507059e+37  ;;  %v896_v6 = vsel %vm894_vm8, 1.0, %v2419_v47 }
 0x615   :  { %v963_v36 = vmul.f32 0.5, %v2969_v13 }
 0x616   :  { %v898_v63 = vmul.f32 0.3275911, %v892_v62  ;;  %v950_v48 = vsub.f32 0.0, %v892_v62 }
 0x618   :  { %v2290_v0 = vpop.eup %2289  ;;  %v900_v1 = vadd.f32 1.0, %v898_v63  ;;  %v952_v46 = vmul.f32 %v950_v48, %v892_v62 }
 0x619   :  { %v902_v38 = vmul.f32 %v2290_v0, %v899_v30  ;;  %vm907_vm11 = vweird.f32 %v2290_v0 }
 0x61a   :  { %2291 = vrcp.f32 %v900_v1  ;;  %vm908_vm13 = vmor %vm906_vm12, %vm907_vm11  ;;  %v927_v23 = vand.u32 2147483648, %v900_v1  ;;  %v925_v28 = vand.u32 2147483647, %v900_v1  ;;  %vm921_vm4 = vweird.f32 %v900_v1 }
 0x61b   :  { %v903_v7 = vsub.f32 1.0, %v902_v38  ;;  %2293 = vpow2.f32 %v953_v34  ;;  %v955_v19 = vmul.f32 1.442695, %v952_v46  ;;  %v2350_v34 = vld [vmem:[%s3456_s3 + $0x70] sm:$0xff] }
 0x61c   :  { %v928_v35 = vor.u32 1.1754944e-38, %v927_v23  ;;  %vm926_vm6 = vcmp.eq.f32.partialorder %v925_v28, 8.507059e+37 }
 0x61d   :  { %v904_v2 = vmul.f32 %v2290_v0, %v903_v7  ;;  %2295 = vpow2.f32 %v955_v19  ;;  %v2241_v19 = vld [vmem:[%s3469_s16] ss:$0 sm:$0xff] }
 0x61f   :  { %v905_v5 = vadd.f32 %v2290_v0, %v904_v2  ;;  %v964_v2 = vmul.f32 0.5, %v2972_v61 }
 0x620   :  { %v2292_v10 = vpop.eup %2291 }
 0x621   :  { %v909_v11 = vsel %vm908_vm13, %v2290_v0, %v905_v5  ;;  %v917_v15 = vmul.f32 %v2292_v10, %v900_v1  ;;  %vm922_vm15 = vweird.f32 %v2292_v10  ;;  %v2294_v25 = vpop.eup %2293  ;;  %v895_v0 = vsel %vm893_vm7, 1.0, %v2419_v47 }
 0x622   :  { %v914_v12 = vsel %vm911_vm14, %v913_v31, %v909_v11  ;;  %vm923_vm5 = vmor %vm921_vm4, %vm922_vm15  ;;  %v2240_v31 = vld [vmem:[%s3468_s15] ss:$0 sm:$0xff] }
 0x623   :  { %v931_v17 = vmul.f32 1.0614054, %v914_v12  ;;  %v918_v21 = vsub.f32 1.0, %v917_v15  ;;  %v2296_v63 = vpop.eup %2295 }
 0x625   :  { %v933_v22 = vadd.f32 -1.4531521, %v931_v17  ;;  %v919_v37 = vmul.f32 %v2292_v10, %v918_v21 }
 0x627   :  { %v935_v41 = vmul.f32 %v933_v22, %v914_v12  ;;  %v920_v33 = vadd.f32 %v2292_v10, %v919_v37 }
 0x629   :  { %v937_v39 = vadd.f32 1.4214138, %v935_v41  ;;  %v924_v16 = vsel %vm923_vm5, %v2292_v10, %v920_v33 }
 0x62a   :  { %v929_v40 = vsel %vm926_vm6, %v928_v35, %v924_v16  ;;  %v2349_v35 = vld [vmem:[%s3456_s3 + $0x78] sm:$0xff] }
 0x62b   :  { %v939_v44 = vmul.f32 %v937_v39, %v914_v12  ;;  %v932_v27 = vmul.f32 1.0614054, %v929_v40  ;;  %v2215_v39 = vld [vmem:[%s3458_s5 + $0x10] sm:$0xff] }
 0x62d   :  { %v941_v50 = vadd.f32 -0.28449672, %v939_v44  ;;  %v934_v52 = vadd.f32 -1.4531521, %v932_v27 }
 0x62f   :  { %v943_v54 = vmul.f32 %v941_v50, %v914_v12  ;;  %v936_v9 = vmul.f32 %v934_v52, %v929_v40  ;;  %v2351_v52 = vld [vmem:[%s3456_s3 + $0x68] sm:$0xff] }
 0x631   :  { %v945_v20 = vadd.f32 0.2548296, %v943_v54  ;;  %v938_v60 = vadd.f32 1.4214138, %v936_v9  ;;  %v2352_v9 = vld [vmem:[%s3456_s3 + $0x60] sm:$0xff] }
 0x633   :  { %v947_v43 = vmul.f32 %v945_v20, %v914_v12  ;;  %v940_v14 = vmul.f32 %v938_v60, %v929_v40 }
 0x635   :  { %v957_v24 = vmul.f32 %v2294_v25, %v947_v43  ;;  %v942_v58 = vadd.f32 -0.28449672, %v940_v14 }
 0x637   :  { %v944_v30 = vmul.f32 %v942_v58, %v929_v40  ;;  %v959_v45 = vsub.f32 1.0, %v957_v24  ;;  %v2353_v24 = vld [vmem:[%s3456_s3 + $0x58] sm:$0xff]  ;;  %v2242_v58 = vld [vmem:[%s3470_s17] ss:$0 sm:$0xff] }
 0x639   :  { %v946_v29 = vadd.f32 0.2548296, %v944_v30  ;;  %v961_v38 = vmul.f32 %v959_v45, %v895_v0 }
 0x63b   :  { %v948_v62 = vmul.f32 %v946_v29, %v929_v40  ;;  %v965_v51 = vadd.f32 1.0, %v961_v38 }
 0x63d   :  { %v958_v49 = vmul.f32 %v2296_v63, %v948_v62  ;;  %v967_v3 = vmul.f32 %v965_v51, %v963_v36  ;;  %v2354_v63 = vld [vmem:[%s3456_s3 + $0x50] sm:$0xff] }
 0x63f   :  { %v960_v1 = vsub.f32 1.0, %v958_v49 }
 0x641   :  { %v962_v7 = vmul.f32 %v960_v1, %v896_v6  ;;  %v2355_v1 = vld [vmem:[%s3456_s3 + $0x48] sm:$0xff] }
 0x643   :  { %v966_v8 = vadd.f32 1.0, %v962_v7  ;;  %v2356_v7 = vld [vmem:[%s3456_s3 + $0x40] sm:$0xff] }
 0x645   :  { %v968_v53 = vmul.f32 %v966_v8, %v964_v2  ;;  %v2218_v8 = vld [vmem:[%s3461_s8 + $0x18] sm:$0xff] }
 0x647   :  { %v969_v5 = vpack.c.bf16 %v968_v53, %v967_v3  ;;  %v1189_v3 = vsel %vm127_vm0, %v2218_v8, 0  ;;  %v2217_v53 = vld [vmem:[%s3461_s8 + $0x10] sm:$0xff]  ;;  %v2243_v8 = vld [vmem:[%s3459_s6 + $0x1] ss:$0 sm:$0xff] }
 0x648   :  { %1197 = vmatpush.bf16.xpose.msrb.mxu2 %v1189_v3 }
 0x649   :  { %2090 = vmatmul.msk.bf16.vlgmr.msra.gmra.mxu3 %vm350_vm1, %v969_v5  ;;  %v1186_v5 = vsel %vm127_vm0, %v2217_v53, 0 }
 0x650   :  { %1198 = vmatpush.bf16.xpose.msrb.mxu2 %v1186_v5 }
 0x6cc   :  { %v1018_v10 = vpop.f32.mrf.mxu3 }
 0x6cd   :  { %v1019_v55 = vadd.f32 %v2240_v31, %v1018_v10  ;;  %v2244_v10 = vld [vmem:[%s3460_s7 + $0x1] ss:$0 sm:$0xff] }
 0x6cf   :  { %v1023_v11 = vadd.f32 %v1019_v55, %v2959_v56 }
 0x6d1   :  { %v1027_v13 = vsel %vm127_vm0, %v1023_v11, 0.0 }
 0x6d2   :  { %1028 = vadd.xlane.f32.xlu0 %v1027_v13 }
 0x6d4   :  { %v1020_v61 = vpop.f32.mrf.mxu3 }
 0x6d5   :  { %v1021_v12 = vadd.f32 %v2240_v31, %v1020_v61  ;;  %v3082_v61 = vld [vmem:[%s3457_s4] sm:$0xff] }
 0x6d7   :  { %v1024_v57 = vadd.f32 %v1021_v12, %v2961_v59  ;;  %v2216_v59 = vld [vmem:[%s3458_s5 + $0x18] sm:$0xff] }
 0x6d8   :  { %1111 = vmatpush.bf16.msrb.mxu0 %v2216_v59 }
 0x6d9   :  { %v1030_v15 = vsel %vm127_vm0, %v1024_v57, 0.0 }
 0x6da   :  { %1031 = vadd.xlane.f32.xlu2 %v1030_v15 }
 0x6dc   :  { %1112 = vmatpush.bf16.msrb.mxu0 %v2215_v39 }
 0x6e0   :  { %1377 = vmatpush.bf16.msra.mxu0 %v2349_v35 }
 0x6e4   :  { %1378 = vmatpush.bf16.msra.mxu0 %v2350_v34 }
 0x6e8   :  { %1379 = vmatpush.bf16.msra.mxu0 %v2351_v52 }
 0x6ec   :  { %1380 = vmatpush.bf16.msra.mxu0 %v2352_v9 }
 0x6f0   :  { %1381 = vmatpush.bf16.msra.mxu0 %v2353_v24 }
 0x6f4   :  { %1382 = vmatpush.bf16.msra.mxu0 %v2354_v63  ;;  %v2366_v63 = vld [vmem:[%s3479_s26 + $0x8] sm:$0xff] }
 0x6f8   :  { %1383 = vmatpush.bf16.msra.mxu0 %v2355_v1 }
 0x6fc   :  { %1384 = vmatpush.bf16.msra.mxu0 %v2356_v7 }
 0x745   :  { %v1029_v42 = vpop.xlane.xlu0 %1028 }
 0x746   :  { %v1033_v17 = vmul.f32 %v1029_v42, %v2939_v4 }
 0x748   :  { %v1035_v18 = vsub.f32 %v1023_v11, %v1033_v17  ;;  %v3095_v17 = vld [vmem:[%s3457_s4 + $0x18] sm:$0xff] }
 0x74a   :  { %v1037_v21 = vmul.f32 %v1035_v18, %v1035_v18 }
 0x74c   :  { %v1039_v22 = vsel %vm127_vm0, %v1037_v21, 0.0  ;;  %v3101_v21 = vld [vmem:[%s3457_s4 + $0x10] sm:$0xff] }
 0x74d   :  { %v1032_v23 = vpop.xlane.xlu2 %1031  ;;  %1040 = vadd.xlane.f32.xlu0 %v1039_v22 }
 0x74e   :  { %v1034_v56 = vmul.f32 %v1032_v23, %v2939_v4 }
 0x750   :  { %v1036_v37 = vsub.f32 %v1024_v57, %v1034_v56  ;;  %v3088_v57 = vld [vmem:[%s3457_s4 + $0x8] sm:$0xff] }
 0x751   :  { %v3108_v56 = vld [vmem:[%s3457_s4 + $0x28] sm:$0xff] }
 0x752   :  { %v1038_v28 = vmul.f32 %v1036_v37, %v1036_v37 }
 0x754   :  { %v1042_v26 = vsel %vm127_vm0, %v1038_v28, 0.0  ;;  %v3114_v28 = vld [vmem:[%s3457_s4 + $0x20] sm:$0xff] }
 0x755   :  { %1043 = vadd.xlane.f32.xlu2 %v1042_v26 }
 0x7c0   :  { %v1041_v41 = vpop.xlane.xlu0 %1040 }
 0x7c1   :  { %v1045_v32 = vmul.f32 %v1041_v41, %v2939_v4  ;;  %v3121_v41 = vld [vmem:[%s3457_s4 + $0x38] sm:$0xff] }
 0x7c3   :  { %v1047_v33 = vadd.f32 1e-12, %v1045_v32 }
 0x7c5   :  { %2297 = vrsqrt.f32 %v1047_v33  ;;  %vm1055_vm10 = vweird.f32 %v1047_v33 }
 0x7c8   :  { %v1044_v16 = vpop.xlane.xlu2 %1043 }
 0x7c9   :  { %v1046_v44 = vmul.f32 %v1044_v16, %v2939_v4 }
 0x7cb   :  { %v2298_v40 = vpop.eup %2297  ;;  %v1048_v48 = vadd.f32 1e-12, %v1046_v44 }
 0x7cc   :  { %v1050_v27 = vmul.f32 %v2298_v40, %v1047_v33  ;;  %vm1056_vm9 = vweird.f32 %v2298_v40  ;;  %v3127_v33 = vld [vmem:[%s3457_s4 + $0x30] sm:$0xff] }
 0x7cd   :  { %2299 = vrsqrt.f32 %v1048_v48  ;;  %vm1057_vm11 = vmor %vm1055_vm10, %vm1056_vm9  ;;  %vm1065_vm13 = vweird.f32 %v1048_v48 }
 0x7ce   :  { %v1051_v50 = vmul.f32 %v2298_v40, %v1050_v27 }
 0x7d0   :  { %v1052_v54 = vmul.f32 0.5, %v1051_v50 }
 0x7d2   :  { %v1053_v46 = vsub.f32 1.5, %v1052_v54 }
 0x7d3   :  { %v2300_v20 = vpop.eup %2299 }
 0x7d4   :  { %v1054_v60 = vmul.f32 %v2298_v40, %v1053_v46  ;;  %v1060_v43 = vmul.f32 %v2300_v20, %v1048_v48  ;;  %vm1066_vm12 = vweird.f32 %v2300_v20 }
 0x7d5   :  { %vm1067_vm14 = vmor %vm1065_vm13, %vm1066_vm12 }
 0x7d6   :  { %v1058_v14 = vsel %vm1057_vm11, %v2298_v40, %v1054_v60  ;;  %v1061_v25 = vmul.f32 %v2300_v20, %v1060_v43 }
 0x7d7   :  { %v1069_v30 = vmul.f32 %v1058_v14, %v1035_v18 }
 0x7d8   :  { %v1062_v45 = vmul.f32 0.5, %v1061_v25 }
 0x7d9   :  { %v1074_v29 = vmul.f32 %v2241_v19, %v1069_v30 }
 0x7da   :  { %v1063_v62 = vsub.f32 1.5, %v1062_v45 }
 0x7db   :  { %v3045_v0 = vadd.f32 %v2242_v58, %v1074_v29  ;;  %v2365_v29 = vld [vmem:[%s3479_s26] sm:$0xff] }
 0x7dc   :  { %v1064_v38 = vmul.f32 %v2300_v20, %v1063_v62 }
 0x7dd   :  { %1082 = vst.msk [vmem:[#allocation2 + $0x10] sm:$0xff] %vm127_vm0, %v3045_v0 }
 0x7de   :  { %v1068_v49 = vsel %vm1067_vm14, %v2300_v20, %v1064_v38 }
 0x7df   :  { %v1070_v6 = vmul.f32 %v1068_v49, %v1036_v37  ;;  %v2367_v49 = vld [vmem:[%s3479_s26 + $0x10] sm:$0xff] }
 0x7e1   :  { %v1075_v51 = vmul.f32 %v2241_v19, %v1070_v6  ;;  %v2368_v6 = vld [vmem:[%s3479_s26 + $0x18] sm:$0xff] }
 0x7e3   :  { %v3055_v36 = vadd.f32 %v2242_v58, %v1075_v51 }
 0x7e5   :  { %1083 = vst.msk [vmem:[#allocation2 + $0x18] sm:$0xff] %vm127_vm0, %v3055_v36  ;;  %v1084_v2 = vpack.c.bf16 %v3055_v36, %v3045_v0 }
 0x7e7   :  { %2103 = vmatmul.msk.bf16.vlgmr.msrb.gmra.mxu0 %vm127_vm0, %v1084_v2 }
 0x864   :  { %v3070_v31 = vpop.f32.mrf.mxu0 }
 0x865   :  { %v1131_v55 = vadd.f32 %v2244_v10, %v3070_v31 }
 0x867   :  { %v1141_v12 = vmul.f32 %v3082_v61, %v1131_v55  ;;  %v1143_v22 = vmul.f32 %v3101_v21, %v1131_v55  ;;  %v1145_v26 = vmul.f32 %v3114_v28, %v1131_v55  ;;  %v1147_v39 = vmul.f32 %v3127_v33, %v1131_v55 }
 0x868   :  { %v3216_v55 = vadd.f32 %v2243_v8, %v3070_v31 }
 0x86c   :  { %v3076_v11 = vpop.f32.mrf.mxu0 }
 0x86d   :  { %v1132_v13 = vadd.f32 %v2244_v10, %v3076_v11  ;;  %v3143_v40 = vpack.c.bf16 %v3076_v11, %v3070_v31  ;;  %v3213_v5 = vadd.f32 %v2243_v8, %v3076_v11 }
 0x86f   :  { %v1142_v15 = vmul.f32 %v3088_v57, %v1132_v13  ;;  %v1144_v18 = vmul.f32 %v3095_v17, %v1132_v13  ;;  %v1146_v37 = vmul.f32 %v3108_v56, %v1132_v13  ;;  %v1148_v32 = vmul.f32 %v3121_v41, %v1132_v13 }
 0x871   :  { %v1154_v42 = vpack.c.bf16 %v1142_v15, %v1141_v12  ;;  %v1155_v23 = vpack.c.bf16 %v1144_v18, %v1143_v22  ;;  %v1156_v59 = vpack.c.bf16 %v1146_v37, %v1145_v26  ;;  %v1157_v35 = vpack.c.bf16 %v1148_v32, %v1147_v39 }
 0x872   :  { %v1134_v12 = vmul.f32 %v3088_v57, %v3213_v5  ;;  %v1133_v15 = vmul.f32 %v3082_v61, %v3216_v55 }
 0x873   :  { %2118 = vmatmul.msk.bf16.vlgmr.msrb.gmra.mxu2 %vm127_vm0, %v1154_v42 }
 0x874   :  { %v1149_v22 = vpack.c.bf16 %v1134_v12, %v1133_v15  ;;  %v1138_v12 = vmul.f32 %v3108_v56, %v3213_v5 }
 0x883   :  { %2119 = vmatmul.msk.bf16.gmra.mxu2 %vm127_vm0, %v1155_v23 }
 0x893   :  { %2120 = vmatmul.msk.bf16.gmra.mxu2 %vm127_vm0, %v1156_v59 }
 0x8a3   :  { %2121 = vmatmul.msk.bf16.gmra.mxu2 %vm127_vm0, %v1157_v35 }
 0x8f6   :  { %v1200_v16 = vpop.f32.mrf.mxu2 }
 0x8f7   :  { %1252 = vrot.lane.b32.xlu1 %v1200_v16, %s2416_s29  ;;  %1228 = vrot.lane.b32.xlu0 %v1200_v16, %s2417_s30 }
 0x8fe   :  { %v1202_v44 = vpop.f32.mrf.mxu2 }
 0x8ff   :  { %1276 = vrot.lane.b32.xlu0 %v1200_v16, %s2415_s28  ;;  %1230 = vrot.lane.b32.xlu2 %v1202_v44, %s2417_s30 }
 0x906   :  { %v3135_v34 = vpop.f32.mrf.mxu2 }
 0x907   :  { %1254 = vrot.lane.b32.xlu0 %v1202_v44, %s2416_s29  ;;  %1278 = vrot.lane.b32.xlu2 %v1202_v44, %s2415_s28 }
 0x908   :  { %1232 = vrot.lane.b32.xlu1 %v3135_v34, %s2417_s30 }
 0x90e   :  { %v3145_v48 = vpop.f32.mrf.mxu2 }
 0x90f   :  { %1407 = vrot.lane.b32.xlu0 %v3143_v40, %s2415_s28  ;;  %1234 = vrot.lane.b32.xlu2 %v3145_v48, %s2417_s30 }
 0x910   :  { %1258 = vrot.lane.b32.xlu1 %v3145_v48, %s2416_s29 }
 0x916   :  { %v3153_v27 = vpop.f32.mrf.mxu2 }
 0x917   :  { %1256 = vrot.lane.b32.xlu0 %v3135_v34, %s2416_s29  ;;  %1280 = vrot.lane.b32.xlu2 %v3135_v34, %s2415_s28 }
 0x918   :  { %1236 = vrot.lane.b32.xlu1 %v3153_v27, %s2417_s30 }
 0x91e   :  { %v3161_v50 = vpop.f32.mrf.mxu2 }
 0x91f   :  { %1282 = vrot.lane.b32.xlu0 %v3145_v48, %s2415_s28  ;;  %1238 = vrot.lane.b32.xlu2 %v3161_v50, %s2417_s30 }
 0x920   :  { %1262 = vrot.lane.b32.xlu1 %v3161_v50, %s2416_s29 }
 0x926   :  { %v3169_v52 = vpop.f32.mrf.mxu2 }
 0x927   :  { %1260 = vrot.lane.b32.xlu0 %v3153_v27, %s2416_s29  ;;  %1284 = vrot.lane.b32.xlu2 %v3153_v27, %s2415_s28 }
 0x928   :  { %1240 = vrot.lane.b32.xlu1 %v3169_v52, %s2417_s30 }
 0x92e   :  { %v3177_v54 = vpop.f32.mrf.mxu2 }
 0x92f   :  { %1286 = vrot.lane.b32.xlu0 %v3161_v50, %s2415_s28  ;;  %1242 = vrot.lane.b32.xlu2 %v3177_v54, %s2417_s30 }
 0x930   :  { %1266 = vrot.lane.b32.xlu1 %v3177_v54, %s2416_s29 }
 0x937   :  { %1264 = vrot.lane.b32.xlu0 %v3169_v52, %s2416_s29  ;;  %1288 = vrot.lane.b32.xlu2 %v3169_v52, %s2415_s28 }
 0x93f   :  { %1290 = vrot.lane.b32.xlu0 %v3177_v54, %s2415_s28 }
 0x959   :  { %v1231_v46 = vpop.permute.xlu2 %1230 }
 0x95a   :  { %v1301_v25 = vsel %vm127_vm0, %v1202_v44, %v1231_v46  ;;  %v2369_v44 = vld [vmem:[%s3479_s26 + $0x30] sm:$0xff] }
 0x961   :  { %v1279_v60 = vpop.permute.xlu2 %1278 }
 0x969   :  { %v1229_v9 = vpop.permute.xlu0 %1228  ;;  %v1253_v43 = vpop.permute.xlu1 %1252 }
 0x96a   :  { %v1300_v19 = vsel %vm127_vm0, %v1200_v16, %v1229_v9  ;;  %v1235_v2 = vpop.permute.xlu2 %1234 }
 0x96b   :  { %v1308_v14 = vsel %vm350_vm1, %v1300_v19, %v1253_v43  ;;  %v1303_v37 = vsel %vm127_vm0, %v3145_v48, %v1235_v2  ;;  %v2371_v48 = vld [vmem:[%s3479_s26 + $0x20] sm:$0xff]  ;;  %v1136_v19 = vmul.f32 %v3095_v17, %v3213_v5 }
 0x971   :  { %v1277_v20 = vpop.permute.xlu0 %1276 }
 0x972   :  { %v1316_v24 = vsel %vm359_vm2, %v1308_v14, %v1277_v20  ;;  %v1281_v18 = vpop.permute.xlu2 %1280 }
 0x973   :  { %v1324_v62 = vmul.f32 %v2365_v29, %v1316_v24  ;;  %v1325_v38 = vmul.f32 %v2366_v63, %v1316_v24  ;;  %v1135_v24 = vmul.f32 %v3101_v21, %v3216_v55 }
 0x979   :  { %v1255_v58 = vpop.permute.xlu0 %1254 }
 0x97a   :  { %v1309_v30 = vsel %vm350_vm1, %v1301_v25, %v1255_v58  ;;  %v1233_v7 = vpop.permute.xlu1 %1232  ;;  %v1239_v32 = vpop.permute.xlu2 %1238  ;;  %v1150_v58 = vpack.c.bf16 %v1136_v19, %v1135_v24 }
 0x97b   :  { %v1317_v45 = vsel %vm359_vm2, %v1309_v30, %v1279_v60  ;;  %v1302_v23 = vsel %vm127_vm0, %v3135_v34, %v1233_v7  ;;  %v2370_v34 = vld [vmem:[%s3479_s26 + $0x38] sm:$0xff]  ;;  %v2372_v60 = vld [vmem:[%s3479_s26 + $0x28] sm:$0xff]  ;;  %v2373_v7 = vld [vmem:[%s3479_s26 + $0x50] sm:$0xff] }
 0x97c   :  { %v1326_v1 = vmul.f32 %v2367_v49, %v1317_v45  ;;  %v1327_v51 = vmul.f32 %v2368_v6, %v1317_v45 }
 0x97e   :  { %v1340_v3 = vpack.c.bf16 %v1326_v1, %v1324_v62  ;;  %v1341_v53 = vpack.c.bf16 %v1327_v51, %v1325_v38  ;;  %v1305_v38 = vsel %vm127_vm0, %v3161_v50, %v1239_v32  ;;  %v2375_v50 = vld [vmem:[%s3479_s26 + $0x40] sm:$0xff] }
 0x980   :  { %1356 = vmatmul.bf16.vlgmr.msrb.gmra.mxu3 %v1340_v3  ;;  %1385 = vmatmul.bf16.vlgmr.msra.gmra.mxu0 %v1341_v53  ;;  %v2376_v53 = vld [vmem:[%s3479_s26 + $0x48] sm:$0xff] }
 0x981   :  { %v1408_v10 = vpop.permute.xlu0 %1407 }
 0x982   :  { %v1422_v13 = vsel %vm127_vm0, %v1408_v10, 0  ;;  %v1259_v42 = vpop.permute.xlu1 %1258  ;;  %v1285_v29 = vpop.permute.xlu2 %1284 }
 0x983   :  { %1431 = vmatpush.bf16.xpose.msra.mxu1 %v1422_v13  ;;  %v1311_v39 = vsel %vm350_vm1, %v1303_v37, %v1259_v42 }
 0x989   :  { %v1257_v11 = vpop.permute.xlu0 %1256 }
 0x98a   :  { %2122 = vmatmul.msk.bf16.vlgmr.msra.gmra.mxu1 %vm127_vm0, %v1149_v22  ;;  %v1310_v31 = vsel %vm350_vm1, %v1302_v23, %v1257_v11  ;;  %v1237_v59 = vpop.permute.xlu1 %1236  ;;  %v1243_v15 = vpop.permute.xlu2 %1242  ;;  %v1137_v22 = vmul.f32 %v3114_v28, %v3216_v55 }
 0x98b   :  { %v1318_v26 = vsel %vm359_vm2, %v1310_v31, %v1281_v18  ;;  %v1304_v62 = vsel %vm127_vm0, %v3153_v27, %v1237_v59  ;;  %v2374_v27 = vld [vmem:[%s3479_s26 + $0x58] sm:$0xff]  ;;  %v1307_v32 = vsel %vm127_vm0, %v3177_v54, %v1243_v15  ;;  %v2379_v54 = vld [vmem:[%s3479_s26 + $0x60] sm:$0xff]  ;;  %v2383_v15 = vld [vmem:[%s3480_s0 + $0x10] sm:$0xff] }
 0x98c   :  { %v1328_v20 = vmul.f32 %v2371_v48, %v1318_v26  ;;  %v1329_v43 = vmul.f32 %v2372_v60, %v1318_v26  ;;  %v1151_v11 = vpack.c.bf16 %v1138_v12, %v1137_v22 }
 0x991   :  { %v1283_v35 = vpop.permute.xlu0 %1282 }
 0x992   :  { %v1319_v16 = vsel %vm359_vm2, %v1311_v39, %v1283_v35  ;;  %v1263_v45 = vpop.permute.xlu1 %1262  ;;  %v1289_v59 = vpop.permute.xlu2 %1288 }
 0x993   :  { %v1330_v46 = vmul.f32 %v2369_v44, %v1319_v16  ;;  %v1331_v9 = vmul.f32 %v2370_v34, %v1319_v16  ;;  %v1313_v1 = vsel %vm350_vm1, %v1305_v38, %v1263_v45 }
 0x995   :  { %v1342_v14 = vpack.c.bf16 %v1330_v46, %v1328_v20  ;;  %v1343_v25 = vpack.c.bf16 %v1331_v9, %v1329_v43  ;;  %v2377_v46 = vld [vmem:[%s3479_s26 + $0x70] sm:$0xff]  ;;  %v2380_v20 = vld [vmem:[%s3479_s26 + $0x68] sm:$0xff]  ;;  %v1140_v43 = vmul.f32 %v3121_v41, %v3213_v5 }
 0x997   :  { %1361 = vmatmul.bf16.gmra.mxu3 %v1342_v14  ;;  %1390 = vmatmul.bf16.gmra.mxu0 %v1343_v25  ;;  %v1139_v25 = vmul.f32 %v3127_v33, %v3216_v55 }
 0x999   :  { %v1261_v30 = vpop.permute.xlu0 %1260  ;;  %v1152_v24 = vpack.c.bf16 %v1140_v43, %v1139_v25 }
 0x99a   :  { %2123 = vmatmul.msk.bf16.gmra.mxu1 %vm127_vm0, %v1150_v58  ;;  %v1312_v63 = vsel %vm350_vm1, %v1304_v62, %v1261_v30  ;;  %v1241_v13 = vpop.permute.xlu1 %1240 }
 0x99b   :  { %v1320_v49 = vsel %vm359_vm2, %v1312_v63, %v1285_v29  ;;  %v1306_v31 = vsel %vm127_vm0, %v3169_v52, %v1241_v13  ;;  %v2378_v52 = vld [vmem:[%s3479_s26 + $0x78] sm:$0xff]  ;;  %v2381_v63 = vld [vmem:[%s3480_s0] sm:$0xff] }
 0x99c   :  { %v1332_v3 = vmul.f32 %v2375_v50, %v1320_v49  ;;  %v1333_v10 = vmul.f32 %v2376_v53, %v1320_v49 }
 0x9a1   :  { %v1287_v6 = vpop.permute.xlu0 %1286 }
 0x9a2   :  { %v1321_v51 = vsel %vm359_vm2, %v1313_v1, %v1287_v6  ;;  %v1267_v26 = vpop.permute.xlu1 %1266 }
 0x9a3   :  { %v1334_v2 = vmul.f32 %v2373_v7, %v1321_v51  ;;  %v1335_v8 = vmul.f32 %v2374_v27, %v1321_v51  ;;  %v1315_v35 = vsel %vm350_vm1, %v1307_v32, %v1267_v26  ;;  %v2382_v7 = vld [vmem:[%s3480_s0 + $0x8] sm:$0xff]  ;;  %v2384_v26 = vld [vmem:[%s3480_s0 + $0x18] sm:$0xff] }
 0x9a5   :  { %v1344_v42 = vpack.c.bf16 %v1334_v2, %v1332_v3  ;;  %v1345_v18 = vpack.c.bf16 %v1335_v8, %v1333_v10 }
 0x9a7   :  { %1366 = vmatmul.bf16.gmra.mxu3 %v1344_v42  ;;  %1395 = vmatmul.bf16.gmra.mxu0 %v1345_v18 }
 0x9a9   :  { %v1265_v23 = vpop.permute.xlu0 %1264 }
 0x9aa   :  { %2124 = vmatmul.msk.bf16.gmra.mxu1 %vm127_vm0, %v1151_v11  ;;  %v1314_v37 = vsel %vm350_vm1, %v1306_v31, %v1265_v23 }
 0x9ab   :  { %v1322_v39 = vsel %vm359_vm2, %v1314_v37, %v1289_v59 }
 0x9ac   :  { %v1336_v48 = vmul.f32 %v2379_v54, %v1322_v39  ;;  %v1337_v60 = vmul.f32 %v2380_v20, %v1322_v39 }
 0x9b1   :  { %v1291_v16 = vpop.permute.xlu0 %1290 }
 0x9b2   :  { %v1323_v44 = vsel %vm359_vm2, %v1315_v35, %v1291_v16 }
 0x9b3   :  { %v1338_v34 = vmul.f32 %v2377_v46, %v1323_v44  ;;  %v1339_v9 = vmul.f32 %v2378_v52, %v1323_v44  ;;  %v2385_v46 = vld [vmem:[%s3480_s0 + $0x20] sm:$0xff] }
 0x9b5   :  { %v1346_v19 = vpack.c.bf16 %v1338_v34, %v1336_v48  ;;  %v1347_v14 = vpack.c.bf16 %v1339_v9, %v1337_v60  ;;  %v2386_v60 = vld [vmem:[%s3480_s0 + $0x28] sm:$0xff] }
 0x9b7   :  { %1371 = vmatmul.bf16.gmra.mxu3 %v1346_v19  ;;  %1400 = vmatmul.bf16.gmra.mxu0 %v1347_v14 }
 0x9ba   :  { %2125 = vmatmul.msk.bf16.gmra.mxu1 %vm127_vm0, %v1152_v24 }
 0x9fd   :  { %v1386_v58 = vpop.f32.mrf.mxu0 }
 0xa03   :  { %v1357_v30 = vpop.f32.mrf.mxu3 }
 0xa04   :  { %v1387_v45 = vadd.f32 %v1386_v58, %v1357_v30 }
 0xa05   :  { %v1388_v49 = vpop.f32.mrf.mxu0 }
 0xa07   :  { %v1433_v29 = vpop.f32.mrf.mxu1 }
 0xa08   :  { %v1434_v62 = vadd.f32 %v1433_v29, %v1387_v45  ;;  %v2387_v45 = vld [vmem:[%s3480_s0 + $0x30] sm:$0xff] }
 0xa0a   :  { %v3302_v5 = vadd.f32 %v2381_v63, %v1434_v62 }
 0xa0b   :  { %v1359_v38 = vpop.f32.mrf.mxu3 }
 0xa0c   :  { %v1461_v55 = vsel %vm601_vm3, %v3302_v5, -inf  ;;  %v1389_v1 = vadd.f32 %v1388_v49, %v1359_v38 }
 0xa0d   :  { %1462 = vmax.xlane.f32.xlu1 %v1461_v55 }
 0xa0f   :  { %v1435_v6 = vpop.f32.mrf.mxu1 }
 0xa10   :  { %v1436_v51 = vadd.f32 %v1435_v6, %v1389_v1  ;;  %v2388_v6 = vld [vmem:[%s3480_s0 + $0x38] sm:$0xff] }
 0xa12   :  { %v3309_v2 = vadd.f32 %v2382_v7, %v1436_v51 }
 0xa14   :  { %v1391_v27 = vpop.f32.mrf.mxu0  ;;  %v1464_v8 = vsel %vm601_vm3, %v3309_v2, -inf }
 0xa15   :  { %1465 = vmax.xlane.f32.xlu2 %v1464_v8 }
 0xa17   :  { %v1438_v50 = vpop.f32.mrf.mxu1 }
 0xa1a   :  { %v1362_v3 = vpop.f32.mrf.mxu3 }
 0xa1b   :  { %v1392_v53 = vadd.f32 %v1391_v27, %v1362_v3 }
 0xa1c   :  { %v1393_v10 = vpop.f32.mrf.mxu0 }
 0xa1d   :  { %v1439_v13 = vadd.f32 %v1438_v50, %v1392_v53 }
 0xa1f   :  { %v1440_v12 = vpop.f32.mrf.mxu1  ;;  %v3316_v42 = vadd.f32 %v2383_v15, %v1439_v13 }
 0xa21   :  { %v1467_v18 = vsel %vm601_vm3, %v3316_v42, -inf }
 0xa22   :  { %v1364_v22 = vpop.f32.mrf.mxu3  ;;  %1468 = vmax.xlane.f32.xlu0 %v1467_v18 }
 0xa23   :  { %v1394_v11 = vadd.f32 %v1393_v10, %v1364_v22 }
 0xa24   :  { %v1396_v23 = vpop.f32.mrf.mxu0 }
 0xa25   :  { %v1441_v31 = vadd.f32 %v1440_v12, %v1394_v11 }
 0xa27   :  { %v1443_v37 = vpop.f32.mrf.mxu1  ;;  %v1456_v59 = vadd.f32 %v2384_v26, %v1441_v31 }
 0xa29   :  { %v1470_v32 = vsel %vm601_vm3, %v1456_v59, -inf }
 0xa2a   :  { %v1367_v39 = vpop.f32.mrf.mxu3  ;;  %1471 = vmax.xlane.f32.xlu1 %v1470_v32 }
 0xa2b   :  { %v1397_v35 = vadd.f32 %v1396_v23, %v1367_v39 }
 0xa2c   :  { %v1398_v44 = vpop.f32.mrf.mxu0 }
 0xa2d   :  { %v1444_v16 = vadd.f32 %v1443_v37, %v1397_v35 }
 0xa2f   :  { %v1457_v34 = vadd.f32 %v2385_v46, %v1444_v16  ;;  %v1445_v52 = vpop.f32.mrf.mxu1 }
 0xa31   :  { %v1473_v9 = vsel %vm601_vm3, %v1457_v34, -inf }
 0xa32   :  { %v1369_v54 = vpop.f32.mrf.mxu3  ;;  %1474 = vmax.xlane.f32.xlu2 %v1473_v9 }
 0xa33   :  { %v1399_v48 = vadd.f32 %v1398_v44, %v1369_v54 }
 0xa34   :  { %v1401_v19 = vpop.f32.mrf.mxu0 }
 0xa35   :  { %v1446_v20 = vadd.f32 %v1445_v52, %v1399_v48 }
 0xa37   :  { %v1458_v43 = vadd.f32 %v2386_v60, %v1446_v20  ;;  %v1448_v25 = vpop.f32.mrf.mxu1 }
 0xa39   :  { %v1476_v14 = vsel %vm601_vm3, %v1458_v43, -inf }
 0xa3a   :  { %v1372_v24 = vpop.f32.mrf.mxu3  ;;  %1477 = vmax.xlane.f32.xlu0 %v1476_v14 }
 0xa3b   :  { %v1402_v58 = vadd.f32 %v1401_v19, %v1372_v24 }
 0xa3c   :  { %v1403_v63 = vpop.f32.mrf.mxu0 }
 0xa3d   :  { %v1449_v30 = vadd.f32 %v1448_v25, %v1402_v58 }
 0xa3f   :  { %v1459_v29 = vadd.f32 %v2387_v45, %v1449_v30  ;;  %v1450_v55 = vpop.f32.mrf.mxu1 }
 0xa41   :  { %v1479_v62 = vsel %vm601_vm3, %v1459_v29, -inf }
 0xa42   :  { %v1374_v38 = vpop.f32.mrf.mxu3  ;;  %1480 = vmax.xlane.f32.xlu1 %v1479_v62 }
 0xa43   :  { %v1404_v49 = vadd.f32 %v1403_v63, %v1374_v38 }
 0xa45   :  { %v1451_v1 = vadd.f32 %v1450_v55, %v1404_v49 }
 0xa47   :  { %v1460_v51 = vadd.f32 %v2388_v6, %v1451_v1 }
 0xa49   :  { %v1482_v7 = vsel %vm601_vm3, %v1460_v51, -inf }
 0xa4a   :  { %1483 = vmax.xlane.f32.xlu2 %v1482_v7 }
 0xa62   :  { %1553 = vrot.lane.b32.xlu2 %v3143_v40, %s2416_s29 }
 0xa80   :  { %v1463_v27 = vpop.xlane.xlu1 %1462 }
 0xa81   :  { %v1485_v8 = vsub.f32 %v3302_v5, %v1463_v27 }
 0xa83   :  { %v1493_v50 = vmul.f32 1.442695, %v1485_v8 }
 0xa85   :  { %2301 = vpow2.f32 %v1493_v50 }
 0xa88   :  { %v1466_v3 = vpop.xlane.xlu2 %1465 }
 0xa89   :  { %v1486_v53 = vsub.f32 %v3309_v2, %v1466_v3 }
 0xa8b   :  { %v2302_v10 = vpop.eup %2301  ;;  %v1495_v13 = vmul.f32 1.442695, %v1486_v53 }
 0xa8c   :  { %v1509_v12 = vsel %vm601_vm3, %v2302_v10, 0.0 }
 0xa8d   :  { %2303 = vpow2.f32 %v1495_v13  ;;  %1510 = vadd.xlane.f32.xlu0 %v1509_v12 }
 0xa93   :  { %v2304_v15 = vpop.eup %2303 }
 0xa94   :  { %v1512_v18 = vsel %vm601_vm3, %v2304_v15, 0.0 }
 0xa95   :  { %v1469_v22 = vpop.xlane.xlu0 %1468  ;;  %1513 = vadd.xlane.f32.xlu1 %v1512_v18 }
 0xa96   :  { %v1487_v40 = vsub.f32 %v3316_v42, %v1469_v22 }
 0xa98   :  { %v1497_v11 = vmul.f32 1.442695, %v1487_v40 }
 0xa9a   :  { %2305 = vpow2.f32 %v1497_v11 }
 0xa9d   :  { %v1472_v5 = vpop.xlane.xlu1 %1471 }
 0xa9e   :  { %v1488_v23 = vsub.f32 %v1456_v59, %v1472_v5 }
 0xaa0   :  { %v2306_v31 = vpop.eup %2305  ;;  %v1499_v37 = vmul.f32 1.442695, %v1488_v23 }
 0xaa1   :  { %v1515_v2 = vsel %vm601_vm3, %v2306_v31, 0.0 }
 0xaa2   :  { %2307 = vpow2.f32 %v1499_v37  ;;  %1516 = vadd.xlane.f32.xlu0 %v1515_v2 }
 0xaa5   :  { %v1475_v26 = vpop.xlane.xlu2 %1474 }
 0xaa6   :  { %v1489_v32 = vsub.f32 %v1457_v34, %v1475_v26 }
 0xaa8   :  { %v2308_v39 = vpop.eup %2307  ;;  %v1501_v35 = vmul.f32 1.442695, %v1489_v32 }
 0xaa9   :  { %v1518_v16 = vsel %vm601_vm3, %v2308_v39, 0.0 }
 0xaaa   :  { %2309 = vpow2.f32 %v1501_v35  ;;  %1519 = vadd.xlane.f32.xlu1 %v1518_v16  ;;  %v2219_v16 = vld [vmem:[%s3462_s9 + $0x10] sm:$0xff] }
 0xaad   :  { %v1478_v44 = vpop.xlane.xlu0 %1477 }
 0xaae   :  { %v1490_v42 = vsub.f32 %v1458_v43, %v1478_v44 }
 0xab0   :  { %v2310_v46 = vpop.eup %2309  ;;  %v1503_v52 = vmul.f32 1.442695, %v1490_v42 }
 0xab1   :  { %v1521_v59 = vsel %vm601_vm3, %v2310_v46, 0.0 }
 0xab2   :  { %2311 = vpow2.f32 %v1503_v52  ;;  %1522 = vadd.xlane.f32.xlu0 %v1521_v59 }
 0xab5   :  { %v1481_v9 = vpop.xlane.xlu1 %1480 }
 0xab6   :  { %v1491_v54 = vsub.f32 %v1459_v29, %v1481_v9 }
 0xab8   :  { %v2312_v48 = vpop.eup %2311  ;;  %v1505_v20 = vmul.f32 1.442695, %v1491_v54 }
 0xab9   :  { %v1524_v34 = vsel %vm601_vm3, %v2312_v48, 0.0 }
 0xaba   :  { %2313 = vpow2.f32 %v1505_v20  ;;  %1525 = vadd.xlane.f32.xlu1 %v1524_v34 }
 0xabd   :  { %v1484_v60 = vpop.xlane.xlu2 %1483 }
 0xabe   :  { %v1492_v19 = vsub.f32 %v1460_v51, %v1484_v60 }
 0xac0   :  { %v2314_v14 = vpop.eup %2313  ;;  %v1507_v25 = vmul.f32 1.442695, %v1492_v19 }
 0xac1   :  { %v1527_v43 = vsel %vm601_vm3, %v2314_v14, 0.0 }
 0xac2   :  { %2315 = vpow2.f32 %v1507_v25  ;;  %1528 = vadd.xlane.f32.xlu0 %v1527_v43 }
 0xac5   :  { %v1554_v24 = vpop.permute.xlu2 %1553 }
 0xac6   :  { %1575 = vmatpush.bf16.msra.mxu2 %v1554_v24 }
 0xac8   :  { %v2316_v58 = vpop.eup %2315 }
 0xac9   :  { %v1530_v30 = vsel %vm601_vm3, %v2316_v58, 0.0 }
 0xaca   :  { %1531 = vadd.xlane.f32.xlu1 %v1530_v30 }
 0xb00   :  { %v1511_v45 = vpop.xlane.xlu0 %1510 }
 0xb01   :  { %2317 = vrcp.f32 %v1511_v45 }
 0xb07   :  { %v2318_v62 = vpop.eup %2317 }
 0xb08   :  { %v1514_v29 = vpop.xlane.xlu1 %1513  ;;  %v1541_v38 = vmul.f32 %v2318_v62, %v2302_v10 }
 0xb09   :  { %2319 = vrcp.f32 %v1514_v29 }
 0xb0f   :  { %v2320_v63 = vpop.eup %2319 }
 0xb10   :  { %v1542_v49 = vmul.f32 %v2320_v63, %v2304_v15 }
 0xb12   :  { %v1549_v55 = vpack.c.bf16 %v1542_v49, %v1541_v38 }
 0xb14   :  { %2126 = vmatmul.msk.bf16.vlgmr.msra.gmra.mxu2 %vm601_vm3, %v1549_v55 }
 0xb15   :  { %v1517_v1 = vpop.xlane.xlu0 %1516 }
 0xb16   :  { %2321 = vrcp.f32 %v1517_v1 }
 0xb1c   :  { %v2322_v51 = vpop.eup %2321 }
 0xb1d   :  { %v1520_v6 = vpop.xlane.xlu1 %1519  ;;  %v1543_v27 = vmul.f32 %v2322_v51, %v2306_v31 }
 0xb1e   :  { %2323 = vrcp.f32 %v1520_v6 }
 0xb24   :  { %v2324_v7 = vpop.eup %2323 }
 0xb25   :  { %v1544_v8 = vmul.f32 %v2324_v7, %v2308_v39  ;;  %v1523_v3 = vpop.xlane.xlu0 %1522  ;;  %v2220_v39 = vld [vmem:[%s3462_s9 + $0x18] sm:$0xff]  ;;  %s2422_s9 = smov 8  }
 0xb26   :  { %2325 = vrcp.f32 %v1523_v3  ;;  %1638 = vmatpush.bf16.msra.mxu3 %v2220_v39  ;;  %v2246_v39 = vld [vmem:[%s3464_s11 + $0x1] ss:$0 sm:$0xff] }
 0xb27   :  { %v1550_v50 = vpack.c.bf16 %v1544_v8, %v1543_v27  ;;  %v2221_v27 = vld [vmem:[%s3465_s12 + $0x10] sm:$0xff] }
 0xb29   :  { %2127 = vmatmul.msk.bf16.gmra.mxu2 %vm601_vm3, %v1550_v50 }
 0xb2a   :  { %1639 = vmatpush.bf16.msra.mxu3 %v2219_v16 }
 0xb2c   :  { %v2326_v10 = vpop.eup %2325 }
 0xb2d   :  { %v1526_v53 = vpop.xlane.xlu1 %1525  ;;  %v1545_v12 = vmul.f32 %v2326_v10, %v2310_v46 }
 0xb2e   :  { %2327 = vrcp.f32 %v1526_v53 }
 0xb34   :  { %v2328_v13 = vpop.eup %2327 }
 0xb35   :  { %v1546_v15 = vmul.f32 %v2328_v13, %v2312_v48  ;;  %v1529_v22 = vpop.xlane.xlu0 %1528 }
 0xb36   :  { %2329 = vrcp.f32 %v1529_v22 }
 0xb37   :  { %v1551_v18 = vpack.c.bf16 %v1546_v15, %v1545_v12 }
 0xb39   :  { %2128 = vmatmul.msk.bf16.gmra.mxu2 %vm601_vm3, %v1551_v18 }
 0xb3c   :  { %v2330_v11 = vpop.eup %2329 }
 0xb3d   :  { %v1532_v40 = vpop.xlane.xlu1 %1531  ;;  %v1547_v23 = vmul.f32 %v2330_v11, %v2314_v14 }
 0xb3e   :  { %2331 = vrcp.f32 %v1532_v40 }
 0xb44   :  { %v2332_v5 = vpop.eup %2331 }
 0xb45   :  { %v1548_v31 = vmul.f32 %v2332_v5, %v2316_v58 }
 0xb47   :  { %v1552_v37 = vpack.c.bf16 %v1548_v31, %v1547_v23 }
 0xb49   :  { %2129 = vmatmul.msk.bf16.gmra.mxu2 %vm601_vm3, %v1552_v37  ;;  %v2245_v37 = vld [vmem:[%s3463_s10 + $0x1] ss:$0 sm:$0xff] }
 0xb97   :  { %v1577_v2 = vpop.f32.mrf.mxu2 }
 0xb98   :  { %v1597_v9 = vmul.f32 %v3082_v61, %v1577_v2 }
 0xb9f   :  { %v1579_v26 = vpop.f32.mrf.mxu2 }
 0xba0   :  { %v1598_v54 = vmul.f32 %v3088_v57, %v1579_v26 }
 0xbac   :  { %v1582_v32 = vpop.f32.mrf.mxu2 }
 0xbad   :  { %v1599_v52 = vmul.f32 %v3101_v21, %v1582_v32 }
 0xbaf   :  { %v1605_v34 = vadd.f32 %v1599_v52, %v1597_v9 }
 0xbb4   :  { %v1584_v35 = vpop.f32.mrf.mxu2 }
 0xbb5   :  { %v1600_v59 = vmul.f32 %v3095_v17, %v1584_v35 }
 0xbb7   :  { %v1606_v60 = vadd.f32 %v1600_v59, %v1598_v54  ;;  %v2247_v59 = vld [vmem:[%s3466_s13 + $0x1] ss:$0 sm:$0xff] }
 0xbbc   :  { %v1587_v44 = vpop.f32.mrf.mxu2 }
 0xbbd   :  { %v1601_v48 = vmul.f32 %v3114_v28, %v1587_v44 }
 0xbbf   :  { %v1607_v25 = vadd.f32 %v1605_v34, %v1601_v48 }
 0xbc4   :  { %v1589_v42 = vpop.f32.mrf.mxu2 }
 0xbc5   :  { %v1602_v20 = vmul.f32 %v3108_v56, %v1589_v42 }
 0xbc7   :  { %v1608_v43 = vadd.f32 %v1606_v60, %v1602_v20 }
 0xbcc   :  { %v1592_v46 = vpop.f32.mrf.mxu2 }
 0xbcd   :  { %v1603_v19 = vmul.f32 %v3127_v33, %v1592_v46 }
 0xbcf   :  { %v1609_v21 = vadd.f32 %v1607_v25, %v1603_v19 }
 0xbd4   :  { %v1594_v14 = vpop.f32.mrf.mxu2 }
 0xbd5   :  { %v1604_v24 = vmul.f32 %v3121_v41, %v1594_v14 }
 0xbd7   :  { %v1610_v58 = vadd.f32 %v1608_v43, %v1604_v24 }
 0xbd9   :  { %v1611_v17 = vpack.c.bf16 %v1610_v58, %v1609_v21 }
 0xbdb   :  { %2142 = vmatmul.msk.bf16.vlgmr.msra.gmra.mxu3 %vm127_vm0, %v1611_v17 }
 0xc5e   :  { %v1641_v61 = vpop.f32.mrf.mxu3 }
 0xc5f   :  { %v1646_v57 = vadd.f32 %v1641_v61, %v3045_v0  ;;  %v2226_v61 = vld [vmem:[%s3467_s14 + $0x38] sm:$0xff] }
 0xc60   :  { %1872 = vmatpush.bf16.msrb.mxu1 %v2226_v61 }
 0xc61   :  { %v1652_v28 = vsel %vm127_vm0, %v1646_v57, 0.0 }
 0xc62   :  { %1653 = vadd.xlane.f32.xlu2 %v1652_v28 }
 0xc66   :  { %v1643_v56 = vpop.f32.mrf.mxu3 }
 0xc67   :  { %v1647_v30 = vadd.f32 %v1643_v56, %v3055_v36  ;;  %v2222_v36 = vld [vmem:[%s3465_s12 + $0x18] sm:$0xff] }
 0xc68   :  { %1738 = vmatpush.bf16.msrb.mxu0 %v2222_v36 }
 0xc69   :  { %v1655_v33 = vsel %vm127_vm0, %v1647_v30, 0.0 }
 0xc6a   :  { %1656 = vadd.xlane.f32.xlu0 %v1655_v33  ;;  %v2225_v33 = vld [vmem:[%s3467_s14 + $0x30] sm:$0xff] }
 0xc6b   :  { %1873 = vmatpush.bf16.msrb.mxu1 %v2225_v33  ;;  %v2248_v33 = vld [vmem:[%s3468_s15 + $0x1] ss:$0 sm:$0xff] }
 0xc6c   :  { %1739 = vmatpush.bf16.msrb.mxu0 %v2221_v27  ;;  %v2223_v27 = vld [vmem:[%s3467_s14 + $0x20] sm:$0xff] }
 0xcd5   :  { %v1654_v45 = vpop.xlane.xlu2 %1653 }
 0xcd6   :  { %v1658_v41 = vmul.f32 %v1654_v45, %v2939_v4 }
 0xcd8   :  { %v1660_v29 = vsub.f32 %v1646_v57, %v1658_v41 }
 0xcda   :  { %v1662_v62 = vmul.f32 %v1660_v29, %v1660_v29 }
 0xcdc   :  { %v1664_v63 = vsel %vm127_vm0, %v1662_v62, 0.0 }
 0xcdd   :  { %1665 = vadd.xlane.f32.xlu1 %v1664_v63  ;;  %v1657_v38 = vpop.xlane.xlu0 %1656 }
 0xcde   :  { %v1659_v0 = vmul.f32 %v1657_v38, %v2939_v4 }
 0xce0   :  { %v1661_v49 = vsub.f32 %v1647_v30, %v1659_v0  ;;  %v2224_v0 = vld [vmem:[%s3467_s14 + $0x28] sm:$0xff] }
 0xce1   :  { %1874 = vmatpush.bf16.msrb.mxu1 %v2224_v0 }
 0xce2   :  { %v1663_v55 = vmul.f32 %v1661_v49, %v1661_v49 }
 0xce4   :  { %v1667_v1 = vsel %vm127_vm0, %v1663_v55, 0.0 }
 0xce5   :  { %1668 = vadd.xlane.f32.xlu0 %v1667_v1  ;;  %1875 = vmatpush.bf16.msrb.mxu1 %v2223_v27 }
 0xd50   :  { %v1666_v6 = vpop.xlane.xlu1 %1665 }
 0xd51   :  { %v1670_v51 = vmul.f32 %v1666_v6, %v2939_v4 }
 0xd53   :  { %v1672_v7 = vadd.f32 1e-12, %v1670_v51 }
 0xd55   :  { %2333 = vrsqrt.f32 %v1672_v7  ;;  %vm1680_vm3 = vweird.f32 %v1672_v7 }
 0xd58   :  { %v1669_v8 = vpop.xlane.xlu0 %1668 }
 0xd59   :  { %v1671_v50 = vmul.f32 %v1669_v8, %v2939_v4 }
 0xd5b   :  { %v2334_v3 = vpop.eup %2333  ;;  %v1673_v53 = vadd.f32 1e-12, %v1671_v50 }
 0xd5c   :  { %v1675_v10 = vmul.f32 %v2334_v3, %v1672_v7  ;;  %vm1681_vm2 = vweird.f32 %v2334_v3 }
 0xd5d   :  { %2335 = vrsqrt.f32 %v1673_v53  ;;  %vm1682_vm15 = vmor %vm1680_vm3, %vm1681_vm2  ;;  %vm1690_vm5 = vweird.f32 %v1673_v53 }
 0xd5e   :  { %v1676_v13 = vmul.f32 %v2334_v3, %v1675_v10 }
 0xd60   :  { %v1677_v12 = vmul.f32 0.5, %v1676_v13 }
 0xd62   :  { %v1678_v15 = vsub.f32 1.5, %v1677_v12 }
 0xd63   :  { %v2336_v18 = vpop.eup %2335 }
 0xd64   :  { %v1679_v22 = vmul.f32 %v2334_v3, %v1678_v15  ;;  %v1685_v40 = vmul.f32 %v2336_v18, %v1673_v53  ;;  %vm1691_vm4 = vweird.f32 %v2336_v18 }
 0xd65   :  { %vm1692_vm6 = vmor %vm1690_vm5, %vm1691_vm4 }
 0xd66   :  { %v1686_v11 = vmul.f32 %v2336_v18, %v1685_v40  ;;  %v1683_v5 = vsel %vm1682_vm15, %v2334_v3, %v1679_v22 }
 0xd67   :  { %v1694_v2 = vmul.f32 %v1683_v5, %v1660_v29 }
 0xd68   :  { %v1687_v23 = vmul.f32 0.5, %v1686_v11 }
 0xd69   :  { %v1699_v35 = vmul.f32 %v2245_v37, %v1694_v2 }
 0xd6a   :  { %v1688_v31 = vsub.f32 1.5, %v1687_v23 }
 0xd6b   :  { %v3394_v42 = vadd.f32 %v2246_v39, %v1699_v35 }
 0xd6c   :  { %v1689_v26 = vmul.f32 %v2336_v18, %v1688_v31 }
 0xd6e   :  { %v1693_v32 = vsel %vm1692_vm6, %v2336_v18, %v1689_v26 }
 0xd6f   :  { %v1695_v16 = vmul.f32 %v1693_v32, %v1661_v49 }
 0xd71   :  { %v1700_v44 = vmul.f32 %v2245_v37, %v1695_v16 }
 0xd73   :  { %v3396_v46 = vadd.f32 %v2246_v39, %v1700_v44 }
 0xd75   :  { %v1706_v52 = vpack.c.bf16 %v3396_v46, %v3394_v42 }
 0xd77   :  { %2158 = vmatmul.msk.bf16.vlgmr.msrb.gmra.mxu0 %vm127_vm0, %v1706_v52 }
 0xdf4   :  { %v1741_v9 = vpop.f32.mrf.mxu0 }
 0xdf5   :  { %v3404_v54 = vadd.f32 %v2247_v59, %v1741_v9 }
 0xdf7   :  { %v1746_v48 = vand.u32 2147483647, %v3404_v54  ;;  %vm1750_vm2 = vcmp.ge.f32.partialorder %v3404_v54, 0.0 }
 0xdf9   :  { %v1748_v20 = vmul.f32 0.70710677, %v1746_v48 }
 0xdfb   :  { %v1754_v34 = vmul.f32 0.3275911, %v1748_v20  ;;  %v1806_v55 = vsub.f32 0.0, %v1748_v20 }
 0xdfc   :  { %v1743_v60 = vpop.f32.mrf.mxu0 }
 0xdfd   :  { %v1756_v19 = vadd.f32 1.0, %v1754_v34  ;;  %v3407_v14 = vadd.f32 %v2247_v59, %v1743_v60  ;;  %v1808_v50 = vmul.f32 %v1806_v55, %v1748_v20  ;;  %v1752_v60 = vsel %vm1750_vm2, 1.0, %v2419_v47 }
 0xdff   :  { %2337 = vrcp.f32 %v1756_v19  ;;  %v1747_v25 = vand.u32 2147483647, %v3407_v14  ;;  %v1769_v28 = vand.u32 2147483648, %v1756_v19  ;;  %v1767_v30 = vand.u32 2147483647, %v1756_v19 }
 0xe00   :  { %vm1763_vm8 = vweird.f32 %v1756_v19  ;;  %v1810_v15 = vmul.f32 1.442695, %v1808_v50  ;;  %vm1751_vm3 = vcmp.ge.f32.partialorder %v3407_v14, 0.0  ;;  %v1821_v61 = vmul.f32 0.5, %v3407_v14 }
 0xe01   :  { %v1749_v43 = vmul.f32 0.70710677, %v1747_v25  ;;  %v1770_v41 = vor.u32 1.1754944e-38, %v1769_v28  ;;  %vm1768_vm10 = vcmp.eq.f32.partialorder %v1767_v30, 8.507059e+37 }
 0xe03   :  { %v1755_v24 = vmul.f32 0.3275911, %v1749_v43  ;;  %v1807_v22 = vsub.f32 0.0, %v1749_v43 }
 0xe05   :  { %v2338_v21 = vpop.eup %2337  ;;  %v1757_v17 = vadd.f32 1.0, %v1755_v24  ;;  %v1809_v31 = vmul.f32 %v1807_v22, %v1749_v43  ;;  %v1753_v24 = vsel %vm1751_vm3, 1.0, %v2419_v47 }
 0xe06   :  { %v1759_v58 = vmul.f32 %v2338_v21, %v1756_v19  ;;  %vm1764_vm7 = vweird.f32 %v2338_v21 }
 0xe07   :  { %2339 = vrcp.f32 %v1757_v17  ;;  %vm1765_vm9 = vmor %vm1763_vm8, %vm1764_vm7  ;;  %v1784_v6 = vand.u32 2147483648, %v1757_v17  ;;  %v1782_v7 = vand.u32 2147483647, %v1757_v17  ;;  %vm1778_vm12 = vweird.f32 %v1757_v17 }
 0xe08   :  { %v1760_v57 = vsub.f32 1.0, %v1759_v58  ;;  %2341 = vpow2.f32 %v1810_v15  ;;  %v1812_v39 = vmul.f32 1.442695, %v1809_v31 }
 0xe09   :  { %v1785_v10 = vor.u32 1.1754944e-38, %v1784_v6  ;;  %vm1783_vm14 = vcmp.eq.f32.partialorder %v1782_v7, 8.507059e+37 }
 0xe0a   :  { %v1761_v56 = vmul.f32 %v2338_v21, %v1760_v57  ;;  %2343 = vpow2.f32 %v1812_v39 }
 0xe0c   :  { %v1762_v45 = vadd.f32 %v2338_v21, %v1761_v56 }
 0xe0d   :  { %v2340_v29 = vpop.eup %2339 }
 0xe0e   :  { %v1766_v62 = vsel %vm1765_vm9, %v2338_v21, %v1762_v45  ;;  %v1774_v38 = vmul.f32 %v2340_v29, %v1757_v17  ;;  %vm1779_vm11 = vweird.f32 %v2340_v29  ;;  %v2342_v16 = vpop.eup %2341  ;;  %v1820_v17 = vmul.f32 0.5, %v3404_v54 }
 0xe0f   :  { %v1771_v63 = vsel %vm1768_vm10, %v1770_v41, %v1766_v62  ;;  %vm1780_vm13 = vmor %vm1778_vm12, %vm1779_vm11 }
 0xe10   :  { %v1788_v49 = vmul.f32 1.0614054, %v1771_v63  ;;  %v1775_v1 = vsub.f32 1.0, %v1774_v38  ;;  %v2344_v34 = vpop.eup %2343 }
 0xe12   :  { %v1790_v36 = vadd.f32 -1.4531521, %v1788_v49  ;;  %v1776_v51 = vmul.f32 %v2340_v29, %v1775_v1 }
 0xe14   :  { %v1792_v8 = vmul.f32 %v1790_v36, %v1771_v63  ;;  %v1777_v3 = vadd.f32 %v2340_v29, %v1776_v51 }
 0xe16   :  { %v1794_v53 = vadd.f32 1.4214138, %v1792_v8  ;;  %v1781_v13 = vsel %vm1780_vm13, %v2340_v29, %v1777_v3 }
 0xe17   :  { %v1786_v18 = vsel %vm1783_vm14, %v1785_v10, %v1781_v13 }
 0xe18   :  { %v1796_v12 = vmul.f32 %v1794_v53, %v1771_v63  ;;  %v1789_v40 = vmul.f32 1.0614054, %v1786_v18 }
 0xe1a   :  { %v1798_v11 = vadd.f32 -0.28449672, %v1796_v12  ;;  %v1791_v5 = vadd.f32 -1.4531521, %v1789_v40 }
 0xe1c   :  { %v1800_v23 = vmul.f32 %v1798_v11, %v1771_v63  ;;  %v1793_v37 = vmul.f32 %v1791_v5, %v1786_v18  ;;  %v2249_v5 = vld [vmem:[%s3469_s16 + $0x1] ss:$0 sm:$0xff]  ;;  %s2420_s16 = smov [#allocation2]  }
 0xe1d   :  { %s1949_s29 = sshll.u32 %s2420_s16, 4  ;;  %s1950_s29 = int_to_ptr.vmem [resolvable:$true] %s1949_s29 }
 0xe1e   :  { %v1802_v2 = vadd.f32 0.2548296, %v1800_v23  ;;  %v1795_v26 = vadd.f32 1.4214138, %v1793_v37 }
 0xe20   :  { %v1804_v32 = vmul.f32 %v1802_v2, %v1771_v63  ;;  %v1797_v35 = vmul.f32 %v1795_v26, %v1786_v18 }
 0xe22   :  { %v1814_v44 = vmul.f32 %v2342_v16, %v1804_v32  ;;  %v1799_v52 = vadd.f32 -0.28449672, %v1797_v35 }
 0xe24   :  { %v1801_v59 = vmul.f32 %v1799_v52, %v1786_v18  ;;  %v1816_v9 = vsub.f32 1.0, %v1814_v44 }
 0xe26   :  { %v1803_v48 = vadd.f32 0.2548296, %v1801_v59  ;;  %v1818_v19 = vmul.f32 %v1816_v9, %v1752_v60 }
 0xe28   :  { %v1805_v20 = vmul.f32 %v1803_v48, %v1786_v18  ;;  %v1822_v21 = vadd.f32 1.0, %v1818_v19 }
 0xe2a   :  { %v1815_v25 = vmul.f32 %v2344_v34, %v1805_v20  ;;  %v1824_v28 = vmul.f32 %v1822_v21, %v1820_v17 }
 0xe2c   :  { %v1817_v43 = vsub.f32 1.0, %v1815_v25 }
 0xe2e   :  { %v1819_v58 = vmul.f32 %v1817_v43, %v1753_v24 }
 0xe30   :  { %v1823_v57 = vadd.f32 1.0, %v1819_v58 }
 0xe32   :  { %v1825_v56 = vmul.f32 %v1823_v57, %v1821_v61 }
 0xe34   :  { %v1826_v30 = vpack.c.bf16 %v1825_v56, %v1824_v28 }
 0xe36   :  { %2184 = vmatmul.msk.bf16.vlgmr.msrb.gmra.mxu1 %vm350_vm1, %v1826_v30 }
 0xeb3   :  { %v1877_v45 = vpop.f32.mrf.mxu1 }
 0xeb4   :  { %v1878_v41 = vadd.f32 %v2248_v33, %v1877_v45 }
 0xeb6   :  { %v1882_v47 = vadd.f32 %v1878_v41, %v3394_v42 }
 0xeb8   :  { %v1888_v29 = vsel %vm127_vm0, %v1882_v47, 0.0 }
 0xeb9   :  { %1889 = vadd.xlane.f32.xlu1 %v1888_v29 }
 0xebb   :  { %v1879_v54 = vpop.f32.mrf.mxu1 }
 0xebc   :  { %v1880_v62 = vadd.f32 %v2248_v33, %v1879_v54 }
 0xebe   :  { %v1883_v14 = vadd.f32 %v1880_v62, %v3396_v46 }
 0xec0   :  { %v1891_v63 = vsel %vm127_vm0, %v1883_v14, 0.0 }
 0xec1   :  { %1892 = vadd.xlane.f32.xlu0 %v1891_v63 }
 0xf2c   :  { %v1890_v38 = vpop.xlane.xlu1 %1889 }
 0xf2d   :  { %v1894_v0 = vmul.f32 %v1890_v38, %v2939_v4 }
 0xf2f   :  { %v1896_v49 = vsub.f32 %v1882_v47, %v1894_v0 }
 0xf31   :  { %v1898_v55 = vmul.f32 %v1896_v49, %v1896_v49 }
 0xf33   :  { %v1900_v1 = vsel %vm127_vm0, %v1898_v55, 0.0 }
 0xf34   :  { %v1893_v36 = vpop.xlane.xlu0 %1892  ;;  %1901 = vadd.xlane.f32.xlu1 %v1900_v1 }
 0xf35   :  { %v1895_v42 = vmul.f32 %v1893_v36, %v2939_v4 }
 0xf37   :  { %v1897_v6 = vsub.f32 %v1883_v14, %v1895_v42 }
 0xf39   :  { %v1899_v51 = vmul.f32 %v1897_v6, %v1897_v6 }
 0xf3b   :  { %v1903_v7 = vsel %vm127_vm0, %v1899_v51, 0.0 }
 0xf3c   :  { %1904 = vadd.xlane.f32.xlu0 %v1903_v7 }
 0xfa7   :  { %v1902_v46 = vpop.xlane.xlu1 %1901 }
 0xfa8   :  { %v1906_v27 = vmul.f32 %v1902_v46, %v2939_v4 }
 0xfaa   :  { %v1908_v8 = vadd.f32 1e-12, %v1906_v27 }
 0xfac   :  { %2345 = vrsqrt.f32 %v1908_v8  ;;  %vm1916_vm15 = vweird.f32 %v1908_v8 }
 0xfaf   :  { %v1905_v50 = vpop.xlane.xlu0 %1904 }
 0xfb0   :  { %v1907_v3 = vmul.f32 %v1905_v50, %v2939_v4  ;;  %v2250_v4 = vld [vmem:[%s3470_s17 + $0x1] ss:$0 sm:$0xff]  ;;  %s2421_s17 = smov 128  }
 0xfb2   :  { %v2346_v53 = vpop.eup %2345  ;;  %v1909_v10 = vadd.f32 1e-12, %v1907_v3 }
 0xfb3   :  { %v1911_v13 = vmul.f32 %v2346_v53, %v1908_v8  ;;  %vm1917_vm1 = vweird.f32 %v2346_v53 }
 0xfb4   :  { %2347 = vrsqrt.f32 %v1909_v10  ;;  %vm1918_vm4 = vmor %vm1916_vm15, %vm1917_vm1  ;;  %vm1926_vm6 = vweird.f32 %v1909_v10 }
 0xfb5   :  { %v1912_v12 = vmul.f32 %v2346_v53, %v1911_v13 }
 0xfb7   :  { %v1913_v15 = vmul.f32 0.5, %v1912_v12 }
 0xfb9   :  { %v1914_v18 = vsub.f32 1.5, %v1913_v15 }
 0xfba   :  { %v2348_v22 = vpop.eup %2347 }
 0xfbb   :  { %v1915_v40 = vmul.f32 %v2346_v53, %v1914_v18  ;;  %v1921_v11 = vmul.f32 %v2348_v22, %v1909_v10  ;;  %vm1927_vm5 = vweird.f32 %v2348_v22 }
 0xfbc   :  { %vm1928_vm7 = vmor %vm1926_vm6, %vm1927_vm5 }
 0xfbd   :  { %v1919_v23 = vsel %vm1918_vm4, %v2346_v53, %v1915_v40  ;;  %v1922_v31 = vmul.f32 %v2348_v22, %v1921_v11 }
 0xfbe   :  { %v1930_v37 = vmul.f32 %v1919_v23, %v1896_v49 }
 0xfbf   :  { %v1923_v2 = vmul.f32 0.5, %v1922_v31 }
 0xfc0   :  { %v1935_v26 = vmul.f32 %v2249_v5, %v1930_v37 }
 0xfc1   :  { %v1924_v32 = vsub.f32 1.5, %v1923_v2 }
 0xfc2   :  { %v1940_v39 = vadd.f32 %v2250_v4, %v1935_v26 }
 0xfc3   :  { %v1925_v35 = vmul.f32 %v2348_v22, %v1924_v32 }
 0xfc4   :  { %1943 = vst.msk [vmem:[#allocation2 + $0x20] sm:$0xff] %vm127_vm0, %v1940_v39 }
 0xfc5   :  { %v1929_v16 = vsel %vm1928_vm7, %v2348_v22, %v1925_v35 }
 0xfc6   :  { %v1931_v44 = vmul.f32 %v1929_v16, %v1897_v6 }
 0xfc8   :  { %v1936_v52 = vmul.f32 %v2249_v5, %v1931_v44 }
 0xfca   :  { %v1941_v59 = vadd.f32 %v2250_v4, %v1936_v52 }
 0xfcc   :  { %1944 = vst.msk [vmem:[#allocation2 + $0x28] sm:$0xff] %vm127_vm0, %v1941_v59 }
 0xfcd   :  { %1957 = dma.vmem_to_hbm [thread:$0]  %s1950_s29, 768, %s1952_s21, [#allocation3], %s2421_s17, %s2421_s17, %s2422_s9  }
 0xfce   :  { %2413 = dma.done.wait [#allocation3], 768  }
 0xfcf   :  { %2414 = vsyncadd [#allocation3], 4294966528 }
 0xfd0   :  { %1962 = vsyncpa [#allocation3], 1 }

</bundles_post_ra>
